<compile_context>
chip_gen: v7x
topology: tpu7x:2x2x1
jax: 0.10.0
libtpu: 0.0.40
codegen_flags: <defaults>
</compile_context>

<pallas_src>
import functools

import numpy as np

import jax
import jax.numpy as jnp
from jax.experimental import pallas as pl
from jax.experimental.pallas import tpu as pltpu


# ---------------------------------------------------------------------------
# Pallas kernel: processes NB images per grid step, channels-first everywhere.
# ---------------------------------------------------------------------------
def _block_kernel(expand, K, W, Ho, Wo, NB, has_skip,
                  x_ref,
                  w1t_ref, s1_ref, b1_ref,
                  wdw_ref, s2_ref, b2_ref,
                  pool_ref,
                  sew1t_ref, seb1_ref, sew2t_ref, seb2_ref,
                  w3t_ref, s3_ref, b3_ref,
                  out_ref):
    # Flat length of the W-strided working grid that covers every valid output
    # position of the 'valid' (padding=0) depthwise conv at stride 1.
    L = (Ho - 1) * W + Wo

    wdw = wdw_ref[...]                 # (C, K*K) f32, one column per tap
    s2 = s2_ref[...]                   # (C, 1)
    b2 = b2_ref[...]
    pool_w = pool_ref[...]             # (1, L): 1/(Ho*Wo) on valid columns, 0 elsewhere

    # ---- phase 1: expand conv + depthwise conv (+ folded BN + swish) per image;
    #      keep t2 and its pooled column for the batched SE step.
    t2s = []
    pooled_cols = []
    for b in range(NB):
        xb = x_ref[b]                                                   # (Cin, H*W) bf16
        if expand:
            # 1x1 expansion conv: MXU matmul, bf16 operands / f32 accumulation,
            # result directly channels-first (no transpose anywhere).
            t = jnp.dot(w1t_ref[...], xb, preferred_element_type=jnp.float32)
            t = t * s1_ref[...] + b1_ref[...]
            t = t * jax.nn.sigmoid(t)                                   # swish, (C, H*W) f32
        else:
            t = xb.astype(jnp.float32)

        # Depthwise KxK 'valid' conv (stride 1) on the flattened W-strided grid:
        # each tap is a uniform lane shift (static slice) + per-channel FMA on the
        # VPU.  Columns whose in-row position >= Wo hold wrap-around garbage; they
        # are masked out of the SE mean and dropped at the compacting store.
        acc = jnp.zeros((t.shape[0], L), jnp.float32)
        for kh in range(K):
            for kw in range(K):
                d = kh * W + kw
                acc = acc + t[:, d:d + L] * wdw[:, kh * K + kw:kh * K + kw + 1]
        t2 = acc * s2 + b2
        t2 = t2 * jax.nn.sigmoid(t2)                                    # swish, (C, L) f32
        t2s.append(t2)
        # Masked mean over the valid spatial positions (lane-axis reduce).
        pooled_cols.append(jnp.sum(t2 * pool_w, axis=1, keepdims=True))  # (C, 1)

    # ---- squeeze-and-excitation, batched over the NB images of this step.
    #      Both GEMMs contract over the channel (large) axis on the MXU.
    pooled = pooled_cols[0] if NB == 1 else jnp.concatenate(pooled_cols, axis=1)  # (C, NB)
    h = jnp.dot(sew1t_ref[...], pooled, preferred_element_type=jnp.float32)
    h = h + seb1_ref[...]
    h = h * jax.nn.sigmoid(h)                                           # (se_c, NB)
    g = jnp.dot(sew2t_ref[...], h, preferred_element_type=jnp.float32)
    g = jax.nn.sigmoid(g + seb2_ref[...])                               # (C, NB)

    # ---- phase 2: SE gate, 1x1 projection conv (+ folded BN), residual, store.
    w3t = w3t_ref[...]                                                  # (Cout, C) bf16
    s3 = s3_ref[...]
    b3 = b3_ref[...]
    for b in range(NB):
        t3 = t2s[b] * g[:, b:b + 1]                                     # (C, L)
        o = jnp.dot(w3t, t3.astype(jnp.bfloat16),
                    preferred_element_type=jnp.float32)                 # (Cout, L) f32
        o = o * s3 + b3
        if has_skip:
            # On the W-strided grid the skip is a plain elementwise add (identical
            # flat index); re-read from the input block (Cin == Cout here) instead
            # of keeping a copy of x alive across the kernel.
            o = o + x_ref[b][:, :L].astype(jnp.float32)
        o = o.astype(out_ref.dtype)
        # Compact the valid (Ho, Wo) window row by row into the output block.  The
        # HBM writeback is the whole (NB, Cout, Ho*Wo) block DMA, so it stays dense.
        for ho in range(Ho):
            out_ref[b, :, ho * Wo:(ho + 1) * Wo] = o[:, ho * W:ho * W + Wo]


# ---------------------------------------------------------------------------
# Helpers / wrapper
# ---------------------------------------------------------------------------
def _round_up(x, m):
    return -(-x // m) * m


def _tile_bytes(shape, itemsize):
    """Padding-aware VMEM footprint of one buffer: lane dim rounded to 128,
    second-to-last dim rounded to 8 (32-bit) / 16 (16-bit) sublanes."""
    shape = tuple(int(s) for s in shape)
    if not shape:
        return 4
    lanes = _round_up(shape[-1], 128)
    if len(shape) == 1:
        return lanes * itemsize
    subs = _round_up(shape[-2], 8 * max(1, 4 // itemsize))
    lead = 1
    for s in shape[:-2]:
        lead *= s
    return lead * subs * lanes * itemsize


def block_forward(x_nchw, params, *, kernel_size, stride, expand_ratio,
                  images_per_step=None):
    if stride != 1:
        # TODO(synk): stride > 1 depthwise (strided taps + strided compaction) is
        # not implemented in the Pallas kernel.
        raise NotImplementedError("Pallas Block kernel currently supports stride == 1 only")

    N, Cin, H, W = x_nchw.shape
    K = kernel_size
    Ho, Wo = H - K + 1, W - K + 1
    HW, HoWo = H * W, Ho * Wo
    L = (Ho - 1) * W + Wo
    expand = (expand_ratio != 1)
    C = params["w1"].shape[1] if expand else Cin
    Cout = params["w3"].shape[1]
    se_c = params["sew1"].shape[1]
    has_skip = (Cin == Cout)                    # stride == 1 already enforced

    # ---- weights rearranged channels-first once, outside the kernel (tiny arrays;
    #      in a real model this is done once at weight-load time).
    w1t = params["w1"].T.astype(jnp.bfloat16)                 # (C, Cin)
    s1c = params["s1"].reshape(C, 1)
    b1c = params["b1"].reshape(C, 1)
    wdw_cf = params["wdw"].reshape(K * K, C).T                # (C, K*K)
    s2c = params["s2"].reshape(C, 1)
    b2c = params["b2"].reshape(C, 1)
    sew1t = params["sew1"].T                                  # (se_c, C)
    seb1c = params["seb1"].reshape(se_c, 1)
    sew2t = params["sew2"].T                                  # (C, se_c)
    seb2c = params["seb2"].reshape(C, 1)
    w3t = params["w3"].T.astype(jnp.bfloat16)                 # (Cout, C)
    s3c = params["s3"].reshape(Cout, 1)
    b3c = params["b3"].reshape(Cout, 1)

    # Lane mask (scaled by 1/(Ho*Wo)) selecting the valid columns of the W-strided
    # working grid; precomputed host-side and passed as a tiny input.
    pool_np = np.where((np.arange(L) % W) < Wo, 1.0 / float(HoWo), 0.0)
    pool_w = jnp.asarray(pool_np.reshape(1, L), dtype=jnp.float32)

    weights = [w1t, s1c, b1c, wdw_cf, s2c, b2c, pool_w,
               sew1t, seb1c, sew2t, seb2c, w3t, s3c, b3c]

    # ---- choose NB (images per grid step) with a padding-aware VMEM model.
    weight_bytes = 2 * sum(_tile_bytes(w.shape, w.dtype.itemsize) for w in weights)

    def step_vmem_bytes(nb):
        byt = weight_bytes
        byt += 2 * _tile_bytes((nb, Cin, HW), 2)        # input block (bf16), double-buffered
        byt += 2 * _tile_bytes((nb, Cout, HoWo), 4)     # output block, double-buffered
        byt += nb * _tile_bytes((C, L), 4)              # t2 kept live across the SE step
        byt += _tile_bytes((C, HW), 4) + _tile_bytes((C, L), 4)  # expand out + tap accumulator
        byt += 2 * _tile_bytes((Cout, L), 4)            # projection result / store staging
        return byt

    # Keep >= 2 grid steps when possible so v7x's two TensorCores both get work.
    cap = max(1, min(8, N // 2)) if N > 1 else 1
    if images_per_step is not None:
        cap = max(1, min(cap, int(images_per_step)))
    budget = 24 * 2 ** 20                               # conservative vs v7x's 64 MiB VMEM
    NB = 1
    for nb in range(cap, 0, -1):
        if N % nb == 0 and step_vmem_bytes(nb) <= budget:
            NB = nb
            break
    vmem_limit = int(min(48 * 2 ** 20, max(2 * step_vmem_bytes(NB), 16 * 2 ** 20)))

    # bf16 input halves the HBM read; the spatial flatten is a free metadata reshape.
    x3 = x_nchw.astype(jnp.bfloat16).reshape(N, Cin, HW)

    kernel = functools.partial(_block_kernel, expand, K, W, Ho, Wo, NB, has_skip)

    def _const_spec(a):
        nd = a.ndim
        # Constant index_map -> Pallas does not re-issue the weight DMAs per step.
        # (Single-buffering via pipeline_mode is skipped for portability.)
        return pl.BlockSpec(a.shape, lambda n, _nd=nd: (0,) * _nd)

    in_specs = [pl.BlockSpec((NB, Cin, HW), lambda n: (n, 0, 0))]
    in_specs += [_const_spec(a) for a in weights]

    out = pl.pallas_call(
        kernel,
        out_shape=jax.ShapeDtypeStruct((N, Cout, HoWo), jnp.float32),
        grid_spec=pltpu.PrefetchScalarGridSpec(
            num_scalar_prefetch=0,
            grid=(N // NB,),
            in_specs=in_specs,
            out_specs=pl.BlockSpec((NB, Cout, HoWo), lambda n: (n, 0, 0)),
        ),
        compiler_params=pltpu.CompilerParams(
            # Each step writes a distinct output block -> shard across v7x's two
            # TensorCores; neutral on v5e/v6e.
            dimension_semantics=("parallel",),
            vmem_limit_bytes=vmem_limit,
        ),
    )(x3, *weights)

    # Free metadata reshape back to NCHW.
    return out.reshape(N, Cout, Ho, Wo)


# ---------------------------------------------------------------------------
# Deterministic parameter construction (BN folded into per-channel scale/bias)
# ---------------------------------------------------------------------------
def init_params(key, kernel_size, in_channels, expand_ratio, out_channels,
                se_ratio=0.25):
    C = int(expand_ratio * in_channels)
    se_c = int(in_channels * se_ratio)
    keys = jax.random.split(key, 20)

    def conv_w(k, shape, fan_in):
        return jax.random.normal(k, shape, jnp.float32) / jnp.sqrt(float(fan_in))

    def bn_fold(kg, kb, km, kv, n):
        gamma = 1.0 + 0.1 * jax.random.normal(kg, (1, n), jnp.float32)
        beta = 0.1 * jax.random.normal(kb, (1, n), jnp.float32)
        mean = 0.1 * jax.random.normal(km, (1, n), jnp.float32)
        var = 1.0 + 0.1 * jnp.abs(jax.random.normal(kv, (1, n), jnp.float32))
        scale = gamma / jnp.sqrt(var + 1e-5)
        bias = beta - mean * scale
        return scale, bias

    s1, b1 = bn_fold(keys[7], keys[8], keys[9], keys[10], C)
    s2, b2 = bn_fold(keys[11], keys[12], keys[13], keys[14], C)
    s3, b3 = bn_fold(keys[15], keys[16], keys[17], keys[18], out_channels)

    return dict(
        w1=conv_w(keys[0], (in_channels, C), in_channels),                  # 1x1 expand
        s1=s1, b1=b1,
        wdw=conv_w(keys[1], (kernel_size, kernel_size, C),
                   kernel_size * kernel_size),                              # depthwise
        s2=s2, b2=b2,
        sew1=conv_w(keys[2], (C, se_c), C),
        seb1=0.1 * jax.random.normal(keys[3], (1, se_c), jnp.float32),
        sew2=conv_w(keys[4], (se_c, C), se_c),
        seb2=0.1 * jax.random.normal(keys[5], (1, C), jnp.float32),
        w3=conv_w(keys[6], (C, out_channels), C),                           # 1x1 project
        s3=s3, b3=b3,
    )


# ---------------------------------------------------------------------------
# Pure-JAX reference (NHWC).  mirror_kernel_dtypes=True rounds the input and the
# two 1x1-conv matmul operands to bf16, mirroring the kernel, for a tight check.
# ---------------------------------------------------------------------------
def block_ref(x_nchw, params, *, kernel_size, stride, expand_ratio,
              mirror_kernel_dtypes=False):
    mm_dtype = jnp.bfloat16 if mirror_kernel_dtypes else jnp.float32
    x = jnp.transpose(x_nchw, (0, 2, 3, 1))
    if mirror_kernel_dtypes:
        x = x.astype(jnp.bfloat16)
    x = x.astype(jnp.float32)
    N, H, W, Cin = x.shape
    K, s = kernel_size, stride

    def mm(a, w):
        return jnp.einsum("nhwc,cd->nhwd", a.astype(mm_dtype), w.astype(mm_dtype),
                          preferred_element_type=jnp.float32)

    if expand_ratio != 1:
        t = mm(x, params["w1"])
        t = t * params["s1"] + params["b1"]
        t = t * jax.nn.sigmoid(t)
    else:
        t = x
    C = t.shape[-1]
    Ho = (H - K) // s + 1
    Wo = (W - K) // s + 1
    acc = jnp.zeros((N, Ho, Wo, C), jnp.float32)
    for kh in range(K):
        for kw in range(K):
            acc = acc + t[:, kh:kh + (Ho - 1) * s + 1:s,
                          kw:kw + (Wo - 1) * s + 1:s, :] * params["wdw"][kh, kw]
    t2 = acc * params["s2"] + params["b2"]
    t2 = t2 * jax.nn.sigmoid(t2)
    pooled = t2.mean(axis=(1, 2))                                       # (N, C)
    se = pooled @ params["sew1"] + params["seb1"]
    se = se * jax.nn.sigmoid(se)
    se = jax.nn.sigmoid(se @ params["sew2"] + params["seb2"])
    t3 = t2 * se[:, None, None, :]
    out = mm(t3, params["w3"])
    out = out * params["s3"] + params["b3"]
    Cout = out.shape[-1]
    if stride == 1 and Cin == Cout:
        out = out + x[:, :Ho, :Wo, :]
    return jnp.transpose(out, (0, 3, 1, 2))


if __name__ == "__main__":
    # MBConv-style block; stride==1 and in==out -> skip connection active.
    batch = 4
    in_channels = 8
    H = W = 16
    kernel_size = 3
    stride = 1
    expand_ratio = 2
    out_channels = 8

    key = jax.random.PRNGKey(0)
    kx, kp = jax.random.split(key)
    x = jax.random.normal(kx, (batch, in_channels, H, W), jnp.float32)   # NCHW
    params = init_params(kp, kernel_size, in_channels, expand_ratio, out_channels)

    # Auto-picked NB=2 -> grid=(2,), two images folded into each grid step.
    out = block_forward(x, params, kernel_size=kernel_size, stride=stride,
                        expand_ratio=expand_ratio)
    out = jax.block_until_ready(out)

    Ho = Wo = (H - kernel_size) // stride + 1
    assert out.shape == (batch, out_channels, Ho, Wo), out.shape

    # Tight check vs a reference that mirrors the kernel's bf16 input / MXU operands.
    ref_mirror = jax.block_until_ready(
        block_ref(x, params, kernel_size=kernel_size, stride=stride,
                  expand_ratio=expand_ratio, mirror_kernel_dtypes=True))
    assert jnp.allclose(out, ref_mirror, atol=3e-2, rtol=3e-2), float(
        jnp.max(jnp.abs(out - ref_mirror)))

    # Loose check vs the pure-f32 reference (true module semantics); slack only
    # covers the bf16 input / matmul-operand approximation.
    ref_f32 = jax.block_until_ready(
        block_ref(x, params, kernel_size=kernel_size, stride=stride,
                  expand_ratio=expand_ratio))
    assert jnp.allclose(out, ref_f32, atol=2e-1, rtol=2e-1), float(
        jnp.max(jnp.abs(out - ref_f32)))

    print("KERNEL_OK")
</pallas_src>

<mosaic_0001>
module attributes {stable_mosaic.version = 11 : i64} {
  func.func @_block_kernel(%arg0: i32, %arg1: memref<2x8x256xbf16, #tpu.memory_space<vmem>>, %arg2: memref<16x8xbf16, #tpu.memory_space<vmem>>, %arg3: memref<16x1xf32, #tpu.memory_space<vmem>>, %arg4: memref<16x1xf32, #tpu.memory_space<vmem>>, %arg5: memref<16x9xf32, #tpu.memory_space<vmem>>, %arg6: memref<16x1xf32, #tpu.memory_space<vmem>>, %arg7: memref<16x1xf32, #tpu.memory_space<vmem>>, %arg8: memref<1x222xf32, #tpu.memory_space<vmem>>, %arg9: memref<2x16xf32, #tpu.memory_space<vmem>>, %arg10: memref<2x1xf32, #tpu.memory_space<vmem>>, %arg11: memref<16x2xf32, #tpu.memory_space<vmem>>, %arg12: memref<16x1xf32, #tpu.memory_space<vmem>>, %arg13: memref<8x16xbf16, #tpu.memory_space<vmem>>, %arg14: memref<8x1xf32, #tpu.memory_space<vmem>>, %arg15: memref<8x1xf32, #tpu.memory_space<vmem>>, %arg16: memref<2x8x196xf32, #tpu.memory_space<vmem>>) attributes {dimension_semantics = [#tpu.dimension_semantics<parallel>], iteration_bounds = array<i64: 2>, scalar_prefetch = 0 : i64, scratch_operands = 0 : i64, tpu.core_type = #tpu.core_type<tc>, window_params = [{transform_indices = @transform_0, window_bounds = array<i64: 2, 8, 256>}, {pipeline_mode = #tpu.pipeline_mode<synchronous>, transform_indices = @transform_1, window_bounds = array<i64: 16, 8>}, {pipeline_mode = #tpu.pipeline_mode<synchronous>, transform_indices = @transform_2, window_bounds = array<i64: 16, 1>}, {pipeline_mode = #tpu.pipeline_mode<synchronous>, transform_indices = @transform_3, window_bounds = array<i64: 16, 1>}, {pipeline_mode = #tpu.pipeline_mode<synchronous>, transform_indices = @transform_4, window_bounds = array<i64: 16, 9>}, {pipeline_mode = #tpu.pipeline_mode<synchronous>, transform_indices = @transform_5, window_bounds = array<i64: 16, 1>}, {pipeline_mode = #tpu.pipeline_mode<synchronous>, transform_indices = @transform_6, window_bounds = array<i64: 16, 1>}, {pipeline_mode = #tpu.pipeline_mode<synchronous>, transform_indices = @transform_7, window_bounds = array<i64: 1, 222>}, {pipeline_mode = #tpu.pipeline_mode<synchronous>, transform_indices = @transform_8, window_bounds = array<i64: 2, 16>}, {pipeline_mode = #tpu.pipeline_mode<synchronous>, transform_indices = @transform_9, window_bounds = array<i64: 2, 1>}, {pipeline_mode = #tpu.pipeline_mode<synchronous>, transform_indices = @transform_10, window_bounds = array<i64: 16, 2>}, {pipeline_mode = #tpu.pipeline_mode<synchronous>, transform_indices = @transform_11, window_bounds = array<i64: 16, 1>}, {pipeline_mode = #tpu.pipeline_mode<synchronous>, transform_indices = @transform_12, window_bounds = array<i64: 8, 16>}, {pipeline_mode = #tpu.pipeline_mode<synchronous>, transform_indices = @transform_13, window_bounds = array<i64: 8, 1>}, {pipeline_mode = #tpu.pipeline_mode<synchronous>, transform_indices = @transform_14, window_bounds = array<i64: 8, 1>}, {transform_indices = @transform_15, window_bounds = array<i64: 2, 8, 196>}]} {
    %c0 = arith.constant 0 : index
    %c0_0 = arith.constant 0 : index
    %0 = vector.load %arg5[%c0, %c0_0] : memref<16x9xf32, #tpu.memory_space<vmem>>, vector<16x9xf32>
    %c0_1 = arith.constant 0 : index
    %c0_2 = arith.constant 0 : index
    %1 = vector.load %arg6[%c0_1, %c0_2] : memref<16x1xf32, #tpu.memory_space<vmem>>, vector<16x1xf32>
    %c0_3 = arith.constant 0 : index
    %c0_4 = arith.constant 0 : index
    %2 = vector.load %arg7[%c0_3, %c0_4] : memref<16x1xf32, #tpu.memory_space<vmem>>, vector<16x1xf32>
    %c0_5 = arith.constant 0 : index
    %c0_6 = arith.constant 0 : index
    %3 = vector.load %arg8[%c0_5, %c0_6] : memref<1x222xf32, #tpu.memory_space<vmem>>, vector<1x222xf32>
    %c0_7 = arith.constant 0 : index
    %c0_8 = arith.constant 0 : index
    %c0_9 = arith.constant 0 : index
    %4 = vector.load %arg1[%c0_7, %c0_8, %c0_9] : memref<2x8x256xbf16, #tpu.memory_space<vmem>>, vector<1x8x256xbf16>
    %5 = vector.shape_cast %4 : vector<1x8x256xbf16> to vector<8x256xbf16>
    %c0_10 = arith.constant 0 : index
    %c0_11 = arith.constant 0 : index
    %6 = vector.load %arg2[%c0_10, %c0_11] : memref<16x8xbf16, #tpu.memory_space<vmem>>, vector<16x8xbf16>
    %cst = arith.constant dense<0.000000e+00> : vector<16x256xf32>
    %7 = tpu.matmul %6, %5, %cst {dimension_numbers = #tpu.dot_dimension_numbers<[1], [0], [0], [1], [0, 0, 1, 1], [], []>} : vector<16x8xbf16>, vector<8x256xbf16>, vector<16x256xf32> -> vector<16x256xf32>
    %c0_12 = arith.constant 0 : index
    %c0_13 = arith.constant 0 : index
    %8 = vector.load %arg3[%c0_12, %c0_13] : memref<16x1xf32, #tpu.memory_space<vmem>>, vector<16x1xf32>
    %9 = vector.broadcast %8 : vector<16x1xf32> to vector<16x256xf32>
    %10 = arith.mulf %7, %9 : vector<16x256xf32>
    %c0_14 = arith.constant 0 : index
    %c0_15 = arith.constant 0 : index
    %11 = vector.load %arg4[%c0_14, %c0_15] : memref<16x1xf32, #tpu.memory_space<vmem>>, vector<16x1xf32>
    %12 = vector.broadcast %11 : vector<16x1xf32> to vector<16x256xf32>
    %13 = arith.addf %10, %12 : vector<16x256xf32>
    %14 = arith.negf %13 : vector<16x256xf32>
    %15 = math.exp %14 : vector<16x256xf32>
    %cst_16 = arith.constant 1.000000e+00 : f32
    %16 = vector.broadcast %cst_16 : f32 to vector<16x256xf32>
    %17 = arith.addf %16, %15 : vector<16x256xf32>
    %18 = arith.divf %16, %17 : vector<16x256xf32>
    %19 = arith.mulf %13, %18 : vector<16x256xf32>
    %cst_17 = arith.constant 0.000000e+00 : f32
    %20 = vector.broadcast %cst_17 : f32 to vector<16x222xf32>
    %21 = vector.extract_strided_slice %19 {offsets = [0, 0], sizes = [16, 222], strides = [1, 1]} : vector<16x256xf32> to vector<16x222xf32>
    %22 = vector.extract_strided_slice %0 {offsets = [0, 0], sizes = [16, 1], strides = [1, 1]} : vector<16x9xf32> to vector<16x1xf32>
    %23 = vector.broadcast %22 : vector<16x1xf32> to vector<16x222xf32>
    %24 = arith.mulf %21, %23 : vector<16x222xf32>
    %25 = arith.addf %20, %24 : vector<16x222xf32>
    %26 = vector.extract_strided_slice %19 {offsets = [0, 1], sizes = [16, 222], strides = [1, 1]} : vector<16x256xf32> to vector<16x222xf32>
    %27 = vector.extract_strided_slice %0 {offsets = [0, 1], sizes = [16, 1], strides = [1, 1]} : vector<16x9xf32> to vector<16x1xf32>
    %28 = vector.broadcast %27 : vector<16x1xf32> to vector<16x222xf32>
    %29 = arith.mulf %26, %28 : vector<16x222xf32>
    %30 = arith.addf %25, %29 : vector<16x222xf32>
    %31 = vector.extract_strided_slice %19 {offsets = [0, 2], sizes = [16, 222], strides = [1, 1]} : vector<16x256xf32> to vector<16x222xf32>
    %32 = vector.extract_strided_slice %0 {offsets = [0, 2], sizes = [16, 1], strides = [1, 1]} : vector<16x9xf32> to vector<16x1xf32>
    %33 = vector.broadcast %32 : vector<16x1xf32> to vector<16x222xf32>
    %34 = arith.mulf %31, %33 : vector<16x222xf32>
    %35 = arith.addf %30, %34 : vector<16x222xf32>
    %36 = vector.extract_strided_slice %19 {offsets = [0, 16], sizes = [16, 222], strides = [1, 1]} : vector<16x256xf32> to vector<16x222xf32>
    %37 = vector.extract_strided_slice %0 {offsets = [0, 3], sizes = [16, 1], strides = [1, 1]} : vector<16x9xf32> to vector<16x1xf32>
    %38 = vector.broadcast %37 : vector<16x1xf32> to vector<16x222xf32>
    %39 = arith.mulf %36, %38 : vector<16x222xf32>
    %40 = arith.addf %35, %39 : vector<16x222xf32>
    %41 = vector.extract_strided_slice %19 {offsets = [0, 17], sizes = [16, 222], strides = [1, 1]} : vector<16x256xf32> to vector<16x222xf32>
    %42 = vector.extract_strided_slice %0 {offsets = [0, 4], sizes = [16, 1], strides = [1, 1]} : vector<16x9xf32> to vector<16x1xf32>
    %43 = vector.broadcast %42 : vector<16x1xf32> to vector<16x222xf32>
    %44 = arith.mulf %41, %43 : vector<16x222xf32>
    %45 = arith.addf %40, %44 : vector<16x222xf32>
    %46 = vector.extract_strided_slice %19 {offsets = [0, 18], sizes = [16, 222], strides = [1, 1]} : vector<16x256xf32> to vector<16x222xf32>
    %47 = vector.extract_strided_slice %0 {offsets = [0, 5], sizes = [16, 1], strides = [1, 1]} : vector<16x9xf32> to vector<16x1xf32>
    %48 = vector.broadcast %47 : vector<16x1xf32> to vector<16x222xf32>
    %49 = arith.mulf %46, %48 : vector<16x222xf32>
    %50 = arith.addf %45, %49 : vector<16x222xf32>
    %51 = vector.extract_strided_slice %19 {offsets = [0, 32], sizes = [16, 222], strides = [1, 1]} : vector<16x256xf32> to vector<16x222xf32>
    %52 = vector.extract_strided_slice %0 {offsets = [0, 6], sizes = [16, 1], strides = [1, 1]} : vector<16x9xf32> to vector<16x1xf32>
    %53 = vector.broadcast %52 : vector<16x1xf32> to vector<16x222xf32>
    %54 = arith.mulf %51, %53 : vector<16x222xf32>
    %55 = arith.addf %50, %54 : vector<16x222xf32>
    %56 = vector.extract_strided_slice %19 {offsets = [0, 33], sizes = [16, 222], strides = [1, 1]} : vector<16x256xf32> to vector<16x222xf32>
    %57 = vector.extract_strided_slice %0 {offsets = [0, 7], sizes = [16, 1], strides = [1, 1]} : vector<16x9xf32> to vector<16x1xf32>
    %58 = vector.broadcast %57 : vector<16x1xf32> to vector<16x222xf32>
    %59 = arith.mulf %56, %58 : vector<16x222xf32>
    %60 = arith.addf %55, %59 : vector<16x222xf32>
    %61 = vector.extract_strided_slice %19 {offsets = [0, 34], sizes = [16, 222], strides = [1, 1]} : vector<16x256xf32> to vector<16x222xf32>
    %62 = vector.extract_strided_slice %0 {offsets = [0, 8], sizes = [16, 1], strides = [1, 1]} : vector<16x9xf32> to vector<16x1xf32>
    %63 = vector.broadcast %62 : vector<16x1xf32> to vector<16x222xf32>
    %64 = arith.mulf %61, %63 : vector<16x222xf32>
    %65 = arith.addf %60, %64 : vector<16x222xf32>
    %66 = vector.broadcast %1 : vector<16x1xf32> to vector<16x222xf32>
    %67 = arith.mulf %65, %66 : vector<16x222xf32>
    %68 = vector.broadcast %2 : vector<16x1xf32> to vector<16x222xf32>
    %69 = arith.addf %67, %68 : vector<16x222xf32>
    %70 = arith.negf %69 : vector<16x222xf32>
    %71 = math.exp %70 : vector<16x222xf32>
    %cst_18 = arith.constant 1.000000e+00 : f32
    %72 = vector.broadcast %cst_18 : f32 to vector<16x222xf32>
    %73 = arith.addf %72, %71 : vector<16x222xf32>
    %74 = arith.divf %72, %73 : vector<16x222xf32>
    %75 = arith.mulf %69, %74 : vector<16x222xf32>
    %76 = vector.broadcast %3 : vector<1x222xf32> to vector<16x222xf32>
    %77 = arith.mulf %75, %76 : vector<16x222xf32>
    %cst_19 = arith.constant dense<0.000000e+00> : vector<16xf32>
    %78 = vector.multi_reduction <add>, %77, %cst_19 [1] : vector<16x222xf32> to vector<16xf32>
    %79 = vector.shape_cast %78 : vector<16xf32> to vector<16x1xf32>
    %c1 = arith.constant 1 : index
    %c0_20 = arith.constant 0 : index
    %c0_21 = arith.constant 0 : index
    %80 = vector.load %arg1[%c1, %c0_20, %c0_21] : memref<2x8x256xbf16, #tpu.memory_space<vmem>>, vector<1x8x256xbf16>
    %81 = vector.shape_cast %80 : vector<1x8x256xbf16> to vector<8x256xbf16>
    %c0_22 = arith.constant 0 : index
    %c0_23 = arith.constant 0 : index
    %82 = vector.load %arg2[%c0_22, %c0_23] : memref<16x8xbf16, #tpu.memory_space<vmem>>, vector<16x8xbf16>
    %cst_24 = arith.constant dense<0.000000e+00> : vector<16x256xf32>
    %83 = tpu.matmul %82, %81, %cst_24 {dimension_numbers = #tpu.dot_dimension_numbers<[1], [0], [0], [1], [0, 0, 1, 1], [], []>} : vector<16x8xbf16>, vector<8x256xbf16>, vector<16x256xf32> -> vector<16x256xf32>
    %c0_25 = arith.constant 0 : index
    %c0_26 = arith.constant 0 : index
    %84 = vector.load %arg3[%c0_25, %c0_26] : memref<16x1xf32, #tpu.memory_space<vmem>>, vector<16x1xf32>
    %85 = vector.broadcast %84 : vector<16x1xf32> to vector<16x256xf32>
    %86 = arith.mulf %83, %85 : vector<16x256xf32>
    %c0_27 = arith.constant 0 : index
    %c0_28 = arith.constant 0 : index
    %87 = vector.load %arg4[%c0_27, %c0_28] : memref<16x1xf32, #tpu.memory_space<vmem>>, vector<16x1xf32>
    %88 = vector.broadcast %87 : vector<16x1xf32> to vector<16x256xf32>
    %89 = arith.addf %86, %88 : vector<16x256xf32>
    %90 = arith.negf %89 : vector<16x256xf32>
    %91 = math.exp %90 : vector<16x256xf32>
    %cst_29 = arith.constant 1.000000e+00 : f32
    %92 = vector.broadcast %cst_29 : f32 to vector<16x256xf32>
    %93 = arith.addf %92, %91 : vector<16x256xf32>
    %94 = arith.divf %92, %93 : vector<16x256xf32>
    %95 = arith.mulf %89, %94 : vector<16x256xf32>
    %cst_30 = arith.constant 0.000000e+00 : f32
    %96 = vector.broadcast %cst_30 : f32 to vector<16x222xf32>
    %97 = vector.extract_strided_slice %95 {offsets = [0, 0], sizes = [16, 222], strides = [1, 1]} : vector<16x256xf32> to vector<16x222xf32>
    %98 = vector.extract_strided_slice %0 {offsets = [0, 0], sizes = [16, 1], strides = [1, 1]} : vector<16x9xf32> to vector<16x1xf32>
    %99 = vector.broadcast %98 : vector<16x1xf32> to vector<16x222xf32>
    %100 = arith.mulf %97, %99 : vector<16x222xf32>
    %101 = arith.addf %96, %100 : vector<16x222xf32>
    %102 = vector.extract_strided_slice %95 {offsets = [0, 1], sizes = [16, 222], strides = [1, 1]} : vector<16x256xf32> to vector<16x222xf32>
    %103 = vector.extract_strided_slice %0 {offsets = [0, 1], sizes = [16, 1], strides = [1, 1]} : vector<16x9xf32> to vector<16x1xf32>
    %104 = vector.broadcast %103 : vector<16x1xf32> to vector<16x222xf32>
    %105 = arith.mulf %102, %104 : vector<16x222xf32>
    %106 = arith.addf %101, %105 : vector<16x222xf32>
    %107 = vector.extract_strided_slice %95 {offsets = [0, 2], sizes = [16, 222], strides = [1, 1]} : vector<16x256xf32> to vector<16x222xf32>
    %108 = vector.extract_strided_slice %0 {offsets = [0, 2], sizes = [16, 1], strides = [1, 1]} : vector<16x9xf32> to vector<16x1xf32>
    %109 = vector.broadcast %108 : vector<16x1xf32> to vector<16x222xf32>
    %110 = arith.mulf %107, %109 : vector<16x222xf32>
    %111 = arith.addf %106, %110 : vector<16x222xf32>
    %112 = vector.extract_strided_slice %95 {offsets = [0, 16], sizes = [16, 222], strides = [1, 1]} : vector<16x256xf32> to vector<16x222xf32>
    %113 = vector.extract_strided_slice %0 {offsets = [0, 3], sizes = [16, 1], strides = [1, 1]} : vector<16x9xf32> to vector<16x1xf32>
    %114 = vector.broadcast %113 : vector<16x1xf32> to vector<16x222xf32>
    %115 = arith.mulf %112, %114 : vector<16x222xf32>
    %116 = arith.addf %111, %115 : vector<16x222xf32>
    %117 = vector.extract_strided_slice %95 {offsets = [0, 17], sizes = [16, 222], strides = [1, 1]} : vector<16x256xf32> to vector<16x222xf32>
    %118 = vector.extract_strided_slice %0 {offsets = [0, 4], sizes = [16, 1], strides = [1, 1]} : vector<16x9xf32> to vector<16x1xf32>
    %119 = vector.broadcast %118 : vector<16x1xf32> to vector<16x222xf32>
    %120 = arith.mulf %117, %119 : vector<16x222xf32>
    %121 = arith.addf %116, %120 : vector<16x222xf32>
    %122 = vector.extract_strided_slice %95 {offsets = [0, 18], sizes = [16, 222], strides = [1, 1]} : vector<16x256xf32> to vector<16x222xf32>
    %123 = vector.extract_strided_slice %0 {offsets = [0, 5], sizes = [16, 1], strides = [1, 1]} : vector<16x9xf32> to vector<16x1xf32>
    %124 = vector.broadcast %123 : vector<16x1xf32> to vector<16x222xf32>
    %125 = arith.mulf %122, %124 : vector<16x222xf32>
    %126 = arith.addf %121, %125 : vector<16x222xf32>
    %127 = vector.extract_strided_slice %95 {offsets = [0, 32], sizes = [16, 222], strides = [1, 1]} : vector<16x256xf32> to vector<16x222xf32>
    %128 = vector.extract_strided_slice %0 {offsets = [0, 6], sizes = [16, 1], strides = [1, 1]} : vector<16x9xf32> to vector<16x1xf32>
    %129 = vector.broadcast %128 : vector<16x1xf32> to vector<16x222xf32>
    %130 = arith.mulf %127, %129 : vector<16x222xf32>
    %131 = arith.addf %126, %130 : vector<16x222xf32>
    %132 = vector.extract_strided_slice %95 {offsets = [0, 33], sizes = [16, 222], strides = [1, 1]} : vector<16x256xf32> to vector<16x222xf32>
    %133 = vector.extract_strided_slice %0 {offsets = [0, 7], sizes = [16, 1], strides = [1, 1]} : vector<16x9xf32> to vector<16x1xf32>
    %134 = vector.broadcast %133 : vector<16x1xf32> to vector<16x222xf32>
    %135 = arith.mulf %132, %134 : vector<16x222xf32>
    %136 = arith.addf %131, %135 : vector<16x222xf32>
    %137 = vector.extract_strided_slice %95 {offsets = [0, 34], sizes = [16, 222], strides = [1, 1]} : vector<16x256xf32> to vector<16x222xf32>
    %138 = vector.extract_strided_slice %0 {offsets = [0, 8], sizes = [16, 1], strides = [1, 1]} : vector<16x9xf32> to vector<16x1xf32>
    %139 = vector.broadcast %138 : vector<16x1xf32> to vector<16x222xf32>
    %140 = arith.mulf %137, %139 : vector<16x222xf32>
    %141 = arith.addf %136, %140 : vector<16x222xf32>
    %142 = vector.broadcast %1 : vector<16x1xf32> to vector<16x222xf32>
    %143 = arith.mulf %141, %142 : vector<16x222xf32>
    %144 = vector.broadcast %2 : vector<16x1xf32> to vector<16x222xf32>
    %145 = arith.addf %143, %144 : vector<16x222xf32>
    %146 = arith.negf %145 : vector<16x222xf32>
    %147 = math.exp %146 : vector<16x222xf32>
    %cst_31 = arith.constant 1.000000e+00 : f32
    %148 = vector.broadcast %cst_31 : f32 to vector<16x222xf32>
    %149 = arith.addf %148, %147 : vector<16x222xf32>
    %150 = arith.divf %148, %149 : vector<16x222xf32>
    %151 = arith.mulf %145, %150 : vector<16x222xf32>
    %152 = vector.broadcast %3 : vector<1x222xf32> to vector<16x222xf32>
    %153 = arith.mulf %151, %152 : vector<16x222xf32>
    %cst_32 = arith.constant dense<0.000000e+00> : vector<16xf32>
    %154 = vector.multi_reduction <add>, %153, %cst_32 [1] : vector<16x222xf32> to vector<16xf32>
    %155 = vector.shape_cast %154 : vector<16xf32> to vector<16x1xf32>
    %156 = tpu.concatenate %79, %155 in 1 : vector<16x1xf32>, vector<16x1xf32> -> vector<16x2xf32>
    %c0_33 = arith.constant 0 : index
    %c0_34 = arith.constant 0 : index
    %157 = vector.load %arg9[%c0_33, %c0_34] : memref<2x16xf32, #tpu.memory_space<vmem>>, vector<2x16xf32>
    %cst_35 = arith.constant dense<0.000000e+00> : vector<2x2xf32>
    %158 = tpu.matmul %157, %156, %cst_35 {dimension_numbers = #tpu.dot_dimension_numbers<[1], [0], [0], [1], [0, 0, 1, 1], [], []>} : vector<2x16xf32>, vector<16x2xf32>, vector<2x2xf32> -> vector<2x2xf32>
    %c0_36 = arith.constant 0 : index
    %c0_37 = arith.constant 0 : index
    %159 = vector.load %arg10[%c0_36, %c0_37] : memref<2x1xf32, #tpu.memory_space<vmem>>, vector<2x1xf32>
    %160 = vector.broadcast %159 : vector<2x1xf32> to vector<2x2xf32>
    %161 = arith.addf %158, %160 : vector<2x2xf32>
    %162 = arith.negf %161 : vector<2x2xf32>
    %163 = math.exp %162 : vector<2x2xf32>
    %cst_38 = arith.constant 1.000000e+00 : f32
    %164 = vector.broadcast %cst_38 : f32 to vector<2x2xf32>
    %165 = arith.addf %164, %163 : vector<2x2xf32>
    %166 = arith.divf %164, %165 : vector<2x2xf32>
    %167 = arith.mulf %161, %166 : vector<2x2xf32>
    %c0_39 = arith.constant 0 : index
    %c0_40 = arith.constant 0 : index
    %168 = vector.load %arg11[%c0_39, %c0_40] : memref<16x2xf32, #tpu.memory_space<vmem>>, vector<16x2xf32>
    %cst_41 = arith.constant dense<0.000000e+00> : vector<16x2xf32>
    %169 = tpu.matmul %168, %167, %cst_41 {dimension_numbers = #tpu.dot_dimension_numbers<[1], [0], [0], [1], [0, 0, 1, 1], [], []>} : vector<16x2xf32>, vector<2x2xf32>, vector<16x2xf32> -> vector<16x2xf32>
    %c0_42 = arith.constant 0 : index
    %c0_43 = arith.constant 0 : index
    %170 = vector.load %arg12[%c0_42, %c0_43] : memref<16x1xf32, #tpu.memory_space<vmem>>, vector<16x1xf32>
    %171 = vector.broadcast %170 : vector<16x1xf32> to vector<16x2xf32>
    %172 = arith.addf %169, %171 : vector<16x2xf32>
    %173 = arith.negf %172 : vector<16x2xf32>
    %174 = math.exp %173 : vector<16x2xf32>
    %cst_44 = arith.constant 1.000000e+00 : f32
    %175 = vector.broadcast %cst_44 : f32 to vector<16x2xf32>
    %176 = arith.addf %175, %174 : vector<16x2xf32>
    %177 = arith.divf %175, %176 : vector<16x2xf32>
    %c0_45 = arith.constant 0 : index
    %c0_46 = arith.constant 0 : index
    %178 = vector.load %arg13[%c0_45, %c0_46] : memref<8x16xbf16, #tpu.memory_space<vmem>>, vector<8x16xbf16>
    %c0_47 = arith.constant 0 : index
    %c0_48 = arith.constant 0 : index
    %179 = vector.load %arg14[%c0_47, %c0_48] : memref<8x1xf32, #tpu.memory_space<vmem>>, vector<8x1xf32>
    %c0_49 = arith.constant 0 : index
    %c0_50 = arith.constant 0 : index
    %180 = vector.load %arg15[%c0_49, %c0_50] : memref<8x1xf32, #tpu.memory_space<vmem>>, vector<8x1xf32>
    %181 = vector.extract_strided_slice %177 {offsets = [0, 0], sizes = [16, 1], strides = [1, 1]} : vector<16x2xf32> to vector<16x1xf32>
    %182 = vector.broadcast %181 : vector<16x1xf32> to vector<16x222xf32>
    %183 = arith.mulf %75, %182 : vector<16x222xf32>
    %184 = arith.truncf %183 : vector<16x222xf32> to vector<16x222xbf16>
    %cst_51 = arith.constant dense<0.000000e+00> : vector<8x222xf32>
    %185 = tpu.matmul %178, %184, %cst_51 {dimension_numbers = #tpu.dot_dimension_numbers<[1], [0], [0], [1], [0, 0, 1, 1], [], []>} : vector<8x16xbf16>, vector<16x222xbf16>, vector<8x222xf32> -> vector<8x222xf32>
    %186 = vector.broadcast %179 : vector<8x1xf32> to vector<8x222xf32>
    %187 = arith.mulf %185, %186 : vector<8x222xf32>
    %188 = vector.broadcast %180 : vector<8x1xf32> to vector<8x222xf32>
    %189 = arith.addf %187, %188 : vector<8x222xf32>
    %c0_52 = arith.constant 0 : index
    %c0_53 = arith.constant 0 : index
    %c0_54 = arith.constant 0 : index
    %190 = vector.load %arg1[%c0_52, %c0_53, %c0_54] : memref<2x8x256xbf16, #tpu.memory_space<vmem>>, vector<1x8x256xbf16>
    %191 = vector.shape_cast %190 : vector<1x8x256xbf16> to vector<8x256xbf16>
    %192 = vector.extract_strided_slice %191 {offsets = [0, 0], sizes = [8, 222], strides = [1, 1]} : vector<8x256xbf16> to vector<8x222xbf16>
    %193 = arith.extf %192 : vector<8x222xbf16> to vector<8x222xf32>
    %194 = arith.addf %189, %193 : vector<8x222xf32>
    %195 = vector.extract_strided_slice %194 {offsets = [0, 0], sizes = [8, 14], strides = [1, 1]} : vector<8x222xf32> to vector<8x14xf32>
    %c0_55 = arith.constant 0 : index
    %c0_56 = arith.constant 0 : index
    %c0_57 = arith.constant 0 : index
    %196 = vector.load %arg16[%c0_55, %c0_56, %c0_57] : memref<2x8x196xf32, #tpu.memory_space<vmem>>, vector<1x8x14xf32>
    %197 = vector.shape_cast %196 : vector<1x8x14xf32> to vector<8x14xf32>
    %198 = vector.shape_cast %195 : vector<8x14xf32> to vector<1x8x14xf32>
    tpu.vector_store %arg16[%c0_55, %c0_56, %c0_57], %198 {strides = array<i32>} : memref<2x8x196xf32, #tpu.memory_space<vmem>>, vector<1x8x14xf32>,
    %199 = vector.extract_strided_slice %194 {offsets = [0, 16], sizes = [8, 14], strides = [1, 1]} : vector<8x222xf32> to vector<8x14xf32>
    %c0_58 = arith.constant 0 : index
    %c0_59 = arith.constant 0 : index
    %c14 = arith.constant 14 : index
    %200 = vector.load %arg16[%c0_58, %c0_59, %c14] : memref<2x8x196xf32, #tpu.memory_space<vmem>>, vector<1x8x14xf32>
    %201 = vector.shape_cast %200 : vector<1x8x14xf32> to vector<8x14xf32>
    %202 = vector.shape_cast %199 : vector<8x14xf32> to vector<1x8x14xf32>
    tpu.vector_store %arg16[%c0_58, %c0_59, %c14], %202 {strides = array<i32>} : memref<2x8x196xf32, #tpu.memory_space<vmem>>, vector<1x8x14xf32>,
    %203 = vector.extract_strided_slice %194 {offsets = [0, 32], sizes = [8, 14], strides = [1, 1]} : vector<8x222xf32> to vector<8x14xf32>
    %c0_60 = arith.constant 0 : index
    %c0_61 = arith.constant 0 : index
    %c28 = arith.constant 28 : index
    %204 = vector.load %arg16[%c0_60, %c0_61, %c28] : memref<2x8x196xf32, #tpu.memory_space<vmem>>, vector<1x8x14xf32>
    %205 = vector.shape_cast %204 : vector<1x8x14xf32> to vector<8x14xf32>
    %206 = vector.shape_cast %203 : vector<8x14xf32> to vector<1x8x14xf32>
    tpu.vector_store %arg16[%c0_60, %c0_61, %c28], %206 {strides = array<i32>} : memref<2x8x196xf32, #tpu.memory_space<vmem>>, vector<1x8x14xf32>,
    %207 = vector.extract_strided_slice %194 {offsets = [0, 48], sizes = [8, 14], strides = [1, 1]} : vector<8x222xf32> to vector<8x14xf32>
    %c0_62 = arith.constant 0 : index
    %c0_63 = arith.constant 0 : index
    %c42 = arith.constant 42 : index
    %208 = vector.load %arg16[%c0_62, %c0_63, %c42] : memref<2x8x196xf32, #tpu.memory_space<vmem>>, vector<1x8x14xf32>
    %209 = vector.shape_cast %208 : vector<1x8x14xf32> to vector<8x14xf32>
    %210 = vector.shape_cast %207 : vector<8x14xf32> to vector<1x8x14xf32>
    tpu.vector_store %arg16[%c0_62, %c0_63, %c42], %210 {strides = array<i32>} : memref<2x8x196xf32, #tpu.memory_space<vmem>>, vector<1x8x14xf32>,
    %211 = vector.extract_strided_slice %194 {offsets = [0, 64], sizes = [8, 14], strides = [1, 1]} : vector<8x222xf32> to vector<8x14xf32>
    %c0_64 = arith.constant 0 : index
    %c0_65 = arith.constant 0 : index
    %c56 = arith.constant 56 : index
    %212 = vector.load %arg16[%c0_64, %c0_65, %c56] : memref<2x8x196xf32, #tpu.memory_space<vmem>>, vector<1x8x14xf32>
    %213 = vector.shape_cast %212 : vector<1x8x14xf32> to vector<8x14xf32>
    %214 = vector.shape_cast %211 : vector<8x14xf32> to vector<1x8x14xf32>
    tpu.vector_store %arg16[%c0_64, %c0_65, %c56], %214 {strides = array<i32>} : memref<2x8x196xf32, #tpu.memory_space<vmem>>, vector<1x8x14xf32>,
    %215 = vector.extract_strided_slice %194 {offsets = [0, 80], sizes = [8, 14], strides = [1, 1]} : vector<8x222xf32> to vector<8x14xf32>
    %c0_66 = arith.constant 0 : index
    %c0_67 = arith.constant 0 : index
    %c70 = arith.constant 70 : index
    %216 = vector.load %arg16[%c0_66, %c0_67, %c70] : memref<2x8x196xf32, #tpu.memory_space<vmem>>, vector<1x8x14xf32>
    %217 = vector.shape_cast %216 : vector<1x8x14xf32> to vector<8x14xf32>
    %218 = vector.shape_cast %215 : vector<8x14xf32> to vector<1x8x14xf32>
    tpu.vector_store %arg16[%c0_66, %c0_67, %c70], %218 {strides = array<i32>} : memref<2x8x196xf32, #tpu.memory_space<vmem>>, vector<1x8x14xf32>,
    %219 = vector.extract_strided_slice %194 {offsets = [0, 96], sizes = [8, 14], strides = [1, 1]} : vector<8x222xf32> to vector<8x14xf32>
    %c0_68 = arith.constant 0 : index
    %c0_69 = arith.constant 0 : index
    %c84 = arith.constant 84 : index
    %220 = vector.load %arg16[%c0_68, %c0_69, %c84] : memref<2x8x196xf32, #tpu.memory_space<vmem>>, vector<1x8x14xf32>
    %221 = vector.shape_cast %220 : vector<1x8x14xf32> to vector<8x14xf32>
    %222 = vector.shape_cast %219 : vector<8x14xf32> to vector<1x8x14xf32>
    tpu.vector_store %arg16[%c0_68, %c0_69, %c84], %222 {strides = array<i32>} : memref<2x8x196xf32, #tpu.memory_space<vmem>>, vector<1x8x14xf32>,
    %223 = vector.extract_strided_slice %194 {offsets = [0, 112], sizes = [8, 14], strides = [1, 1]} : vector<8x222xf32> to vector<8x14xf32>
    %c0_70 = arith.constant 0 : index
    %c0_71 = arith.constant 0 : index
    %c98 = arith.constant 98 : index
    %224 = vector.load %arg16[%c0_70, %c0_71, %c98] : memref<2x8x196xf32, #tpu.memory_space<vmem>>, vector<1x8x14xf32>
    %225 = vector.shape_cast %224 : vector<1x8x14xf32> to vector<8x14xf32>
    %226 = vector.shape_cast %223 : vector<8x14xf32> to vector<1x8x14xf32>
    tpu.vector_store %arg16[%c0_70, %c0_71, %c98], %226 {strides = array<i32>} : memref<2x8x196xf32, #tpu.memory_space<vmem>>, vector<1x8x14xf32>,
    %227 = vector.extract_strided_slice %194 {offsets = [0, 128], sizes = [8, 14], strides = [1, 1]} : vector<8x222xf32> to vector<8x14xf32>
    %c0_72 = arith.constant 0 : index
    %c0_73 = arith.constant 0 : index
    %c112 = arith.constant 112 : index
    %228 = vector.load %arg16[%c0_72, %c0_73, %c112] : memref<2x8x196xf32, #tpu.memory_space<vmem>>, vector<1x8x14xf32>
    %229 = vector.shape_cast %228 : vector<1x8x14xf32> to vector<8x14xf32>
    %230 = vector.shape_cast %227 : vector<8x14xf32> to vector<1x8x14xf32>
    tpu.vector_store %arg16[%c0_72, %c0_73, %c112], %230 {strides = array<i32>} : memref<2x8x196xf32, #tpu.memory_space<vmem>>, vector<1x8x14xf32>,
    %231 = vector.extract_strided_slice %194 {offsets = [0, 144], sizes = [8, 14], strides = [1, 1]} : vector<8x222xf32> to vector<8x14xf32>
    %c0_74 = arith.constant 0 : index
    %c0_75 = arith.constant 0 : index
    %c126 = arith.constant 126 : index
    %232 = vector.load %arg16[%c0_74, %c0_75, %c126] : memref<2x8x196xf32, #tpu.memory_space<vmem>>, vector<1x8x14xf32>
    %233 = vector.shape_cast %232 : vector<1x8x14xf32> to vector<8x14xf32>
    %234 = vector.shape_cast %231 : vector<8x14xf32> to vector<1x8x14xf32>
    tpu.vector_store %arg16[%c0_74, %c0_75, %c126], %234 {strides = array<i32>} : memref<2x8x196xf32, #tpu.memory_space<vmem>>, vector<1x8x14xf32>,
    %235 = vector.extract_strided_slice %194 {offsets = [0, 160], sizes = [8, 14], strides = [1, 1]} : vector<8x222xf32> to vector<8x14xf32>
    %c0_76 = arith.constant 0 : index
    %c0_77 = arith.constant 0 : index
    %c140 = arith.constant 140 : index
    %236 = vector.load %arg16[%c0_76, %c0_77, %c140] : memref<2x8x196xf32, #tpu.memory_space<vmem>>, vector<1x8x14xf32>
    %237 = vector.shape_cast %236 : vector<1x8x14xf32> to vector<8x14xf32>
    %238 = vector.shape_cast %235 : vector<8x14xf32> to vector<1x8x14xf32>
    tpu.vector_store %arg16[%c0_76, %c0_77, %c140], %238 {strides = array<i32>} : memref<2x8x196xf32, #tpu.memory_space<vmem>>, vector<1x8x14xf32>,
    %239 = vector.extract_strided_slice %194 {offsets = [0, 176], sizes = [8, 14], strides = [1, 1]} : vector<8x222xf32> to vector<8x14xf32>
    %c0_78 = arith.constant 0 : index
    %c0_79 = arith.constant 0 : index
    %c154 = arith.constant 154 : index
    %240 = vector.load %arg16[%c0_78, %c0_79, %c154] : memref<2x8x196xf32, #tpu.memory_space<vmem>>, vector<1x8x14xf32>
    %241 = vector.shape_cast %240 : vector<1x8x14xf32> to vector<8x14xf32>
    %242 = vector.shape_cast %239 : vector<8x14xf32> to vector<1x8x14xf32>
    tpu.vector_store %arg16[%c0_78, %c0_79, %c154], %242 {strides = array<i32>} : memref<2x8x196xf32, #tpu.memory_space<vmem>>, vector<1x8x14xf32>,
    %243 = vector.extract_strided_slice %194 {offsets = [0, 192], sizes = [8, 14], strides = [1, 1]} : vector<8x222xf32> to vector<8x14xf32>
    %c0_80 = arith.constant 0 : index
    %c0_81 = arith.constant 0 : index
    %c168 = arith.constant 168 : index
    %244 = vector.load %arg16[%c0_80, %c0_81, %c168] : memref<2x8x196xf32, #tpu.memory_space<vmem>>, vector<1x8x14xf32>
    %245 = vector.shape_cast %244 : vector<1x8x14xf32> to vector<8x14xf32>
    %246 = vector.shape_cast %243 : vector<8x14xf32> to vector<1x8x14xf32>
    tpu.vector_store %arg16[%c0_80, %c0_81, %c168], %246 {strides = array<i32>} : memref<2x8x196xf32, #tpu.memory_space<vmem>>, vector<1x8x14xf32>,
    %247 = vector.extract_strided_slice %194 {offsets = [0, 208], sizes = [8, 14], strides = [1, 1]} : vector<8x222xf32> to vector<8x14xf32>
    %c0_82 = arith.constant 0 : index
    %c0_83 = arith.constant 0 : index
    %c182 = arith.constant 182 : index
    %248 = vector.load %arg16[%c0_82, %c0_83, %c182] : memref<2x8x196xf32, #tpu.memory_space<vmem>>, vector<1x8x14xf32>
    %249 = vector.shape_cast %248 : vector<1x8x14xf32> to vector<8x14xf32>
    %250 = vector.shape_cast %247 : vector<8x14xf32> to vector<1x8x14xf32>
    tpu.vector_store %arg16[%c0_82, %c0_83, %c182], %250 {strides = array<i32>} : memref<2x8x196xf32, #tpu.memory_space<vmem>>, vector<1x8x14xf32>,
    %251 = vector.extract_strided_slice %177 {offsets = [0, 1], sizes = [16, 1], strides = [1, 1]} : vector<16x2xf32> to vector<16x1xf32>
    %252 = vector.broadcast %251 : vector<16x1xf32> to vector<16x222xf32>
    %253 = arith.mulf %151, %252 : vector<16x222xf32>
    %254 = arith.truncf %253 : vector<16x222xf32> to vector<16x222xbf16>
    %cst_84 = arith.constant dense<0.000000e+00> : vector<8x222xf32>
    %255 = tpu.matmul %178, %254, %cst_84 {dimension_numbers = #tpu.dot_dimension_numbers<[1], [0], [0], [1], [0, 0, 1, 1], [], []>} : vector<8x16xbf16>, vector<16x222xbf16>, vector<8x222xf32> -> vector<8x222xf32>
    %256 = vector.broadcast %179 : vector<8x1xf32> to vector<8x222xf32>
    %257 = arith.mulf %255, %256 : vector<8x222xf32>
    %258 = vector.broadcast %180 : vector<8x1xf32> to vector<8x222xf32>
    %259 = arith.addf %257, %258 : vector<8x222xf32>
    %c1_85 = arith.constant 1 : index
    %c0_86 = arith.constant 0 : index
    %c0_87 = arith.constant 0 : index
    %260 = vector.load %arg1[%c1_85, %c0_86, %c0_87] : memref<2x8x256xbf16, #tpu.memory_space<vmem>>, vector<1x8x256xbf16>
    %261 = vector.shape_cast %260 : vector<1x8x256xbf16> to vector<8x256xbf16>
    %262 = vector.extract_strided_slice %261 {offsets = [0, 0], sizes = [8, 222], strides = [1, 1]} : vector<8x256xbf16> to vector<8x222xbf16>
    %263 = arith.extf %262 : vector<8x222xbf16> to vector<8x222xf32>
    %264 = arith.addf %259, %263 : vector<8x222xf32>
    %265 = vector.extract_strided_slice %264 {offsets = [0, 0], sizes = [8, 14], strides = [1, 1]} : vector<8x222xf32> to vector<8x14xf32>
    %c1_88 = arith.constant 1 : index
    %c0_89 = arith.constant 0 : index
    %c0_90 = arith.constant 0 : index
    %266 = vector.load %arg16[%c1_88, %c0_89, %c0_90] : memref<2x8x196xf32, #tpu.memory_space<vmem>>, vector<1x8x14xf32>
    %267 = vector.shape_cast %266 : vector<1x8x14xf32> to vector<8x14xf32>
    %268 = vector.shape_cast %265 : vector<8x14xf32> to vector<1x8x14xf32>
    tpu.vector_store %arg16[%c1_88, %c0_89, %c0_90], %268 {strides = array<i32>} : memref<2x8x196xf32, #tpu.memory_space<vmem>>, vector<1x8x14xf32>,
    %269 = vector.extract_strided_slice %264 {offsets = [0, 16], sizes = [8, 14], strides = [1, 1]} : vector<8x222xf32> to vector<8x14xf32>
    %c1_91 = arith.constant 1 : index
    %c0_92 = arith.constant 0 : index
    %c14_93 = arith.constant 14 : index
    %270 = vector.load %arg16[%c1_91, %c0_92, %c14_93] : memref<2x8x196xf32, #tpu.memory_space<vmem>>, vector<1x8x14xf32>
    %271 = vector.shape_cast %270 : vector<1x8x14xf32> to vector<8x14xf32>
    %272 = vector.shape_cast %269 : vector<8x14xf32> to vector<1x8x14xf32>
    tpu.vector_store %arg16[%c1_91, %c0_92, %c14_93], %272 {strides = array<i32>} : memref<2x8x196xf32, #tpu.memory_space<vmem>>, vector<1x8x14xf32>,
    %273 = vector.extract_strided_slice %264 {offsets = [0, 32], sizes = [8, 14], strides = [1, 1]} : vector<8x222xf32> to vector<8x14xf32>
    %c1_94 = arith.constant 1 : index
    %c0_95 = arith.constant 0 : index
    %c28_96 = arith.constant 28 : index
    %274 = vector.load %arg16[%c1_94, %c0_95, %c28_96] : memref<2x8x196xf32, #tpu.memory_space<vmem>>, vector<1x8x14xf32>
    %275 = vector.shape_cast %274 : vector<1x8x14xf32> to vector<8x14xf32>
    %276 = vector.shape_cast %273 : vector<8x14xf32> to vector<1x8x14xf32>
    tpu.vector_store %arg16[%c1_94, %c0_95, %c28_96], %276 {strides = array<i32>} : memref<2x8x196xf32, #tpu.memory_space<vmem>>, vector<1x8x14xf32>,
    %277 = vector.extract_strided_slice %264 {offsets = [0, 48], sizes = [8, 14], strides = [1, 1]} : vector<8x222xf32> to vector<8x14xf32>
    %c1_97 = arith.constant 1 : index
    %c0_98 = arith.constant 0 : index
    %c42_99 = arith.constant 42 : index
    %278 = vector.load %arg16[%c1_97, %c0_98, %c42_99] : memref<2x8x196xf32, #tpu.memory_space<vmem>>, vector<1x8x14xf32>
    %279 = vector.shape_cast %278 : vector<1x8x14xf32> to vector<8x14xf32>
    %280 = vector.shape_cast %277 : vector<8x14xf32> to vector<1x8x14xf32>
    tpu.vector_store %arg16[%c1_97, %c0_98, %c42_99], %280 {strides = array<i32>} : memref<2x8x196xf32, #tpu.memory_space<vmem>>, vector<1x8x14xf32>,
    %281 = vector.extract_strided_slice %264 {offsets = [0, 64], sizes = [8, 14], strides = [1, 1]} : vector<8x222xf32> to vector<8x14xf32>
    %c1_100 = arith.constant 1 : index
    %c0_101 = arith.constant 0 : index
    %c56_102 = arith.constant 56 : index
    %282 = vector.load %arg16[%c1_100, %c0_101, %c56_102] : memref<2x8x196xf32, #tpu.memory_space<vmem>>, vector<1x8x14xf32>
    %283 = vector.shape_cast %282 : vector<1x8x14xf32> to vector<8x14xf32>
    %284 = vector.shape_cast %281 : vector<8x14xf32> to vector<1x8x14xf32>
    tpu.vector_store %arg16[%c1_100, %c0_101, %c56_102], %284 {strides = array<i32>} : memref<2x8x196xf32, #tpu.memory_space<vmem>>, vector<1x8x14xf32>,
    %285 = vector.extract_strided_slice %264 {offsets = [0, 80], sizes = [8, 14], strides = [1, 1]} : vector<8x222xf32> to vector<8x14xf32>
    %c1_103 = arith.constant 1 : index
    %c0_104 = arith.constant 0 : index
    %c70_105 = arith.constant 70 : index
    %286 = vector.load %arg16[%c1_103, %c0_104, %c70_105] : memref<2x8x196xf32, #tpu.memory_space<vmem>>, vector<1x8x14xf32>
    %287 = vector.shape_cast %286 : vector<1x8x14xf32> to vector<8x14xf32>
    %288 = vector.shape_cast %285 : vector<8x14xf32> to vector<1x8x14xf32>
    tpu.vector_store %arg16[%c1_103, %c0_104, %c70_105], %288 {strides = array<i32>} : memref<2x8x196xf32, #tpu.memory_space<vmem>>, vector<1x8x14xf32>,
    %289 = vector.extract_strided_slice %264 {offsets = [0, 96], sizes = [8, 14], strides = [1, 1]} : vector<8x222xf32> to vector<8x14xf32>
    %c1_106 = arith.constant 1 : index
    %c0_107 = arith.constant 0 : index
    %c84_108 = arith.constant 84 : index
    %290 = vector.load %arg16[%c1_106, %c0_107, %c84_108] : memref<2x8x196xf32, #tpu.memory_space<vmem>>, vector<1x8x14xf32>
    %291 = vector.shape_cast %290 : vector<1x8x14xf32> to vector<8x14xf32>
    %292 = vector.shape_cast %289 : vector<8x14xf32> to vector<1x8x14xf32>
    tpu.vector_store %arg16[%c1_106, %c0_107, %c84_108], %292 {strides = array<i32>} : memref<2x8x196xf32, #tpu.memory_space<vmem>>, vector<1x8x14xf32>,
    %293 = vector.extract_strided_slice %264 {offsets = [0, 112], sizes = [8, 14], strides = [1, 1]} : vector<8x222xf32> to vector<8x14xf32>
    %c1_109 = arith.constant 1 : index
    %c0_110 = arith.constant 0 : index
    %c98_111 = arith.constant 98 : index
    %294 = vector.load %arg16[%c1_109, %c0_110, %c98_111] : memref<2x8x196xf32, #tpu.memory_space<vmem>>, vector<1x8x14xf32>
    %295 = vector.shape_cast %294 : vector<1x8x14xf32> to vector<8x14xf32>
    %296 = vector.shape_cast %293 : vector<8x14xf32> to vector<1x8x14xf32>
    tpu.vector_store %arg16[%c1_109, %c0_110, %c98_111], %296 {strides = array<i32>} : memref<2x8x196xf32, #tpu.memory_space<vmem>>, vector<1x8x14xf32>,
    %297 = vector.extract_strided_slice %264 {offsets = [0, 128], sizes = [8, 14], strides = [1, 1]} : vector<8x222xf32> to vector<8x14xf32>
    %c1_112 = arith.constant 1 : index
    %c0_113 = arith.constant 0 : index
    %c112_114 = arith.constant 112 : index
    %298 = vector.load %arg16[%c1_112, %c0_113, %c112_114] : memref<2x8x196xf32, #tpu.memory_space<vmem>>, vector<1x8x14xf32>
    %299 = vector.shape_cast %298 : vector<1x8x14xf32> to vector<8x14xf32>
    %300 = vector.shape_cast %297 : vector<8x14xf32> to vector<1x8x14xf32>
    tpu.vector_store %arg16[%c1_112, %c0_113, %c112_114], %300 {strides = array<i32>} : memref<2x8x196xf32, #tpu.memory_space<vmem>>, vector<1x8x14xf32>,
    %301 = vector.extract_strided_slice %264 {offsets = [0, 144], sizes = [8, 14], strides = [1, 1]} : vector<8x222xf32> to vector<8x14xf32>
    %c1_115 = arith.constant 1 : index
    %c0_116 = arith.constant 0 : index
    %c126_117 = arith.constant 126 : index
    %302 = vector.load %arg16[%c1_115, %c0_116, %c126_117] : memref<2x8x196xf32, #tpu.memory_space<vmem>>, vector<1x8x14xf32>
    %303 = vector.shape_cast %302 : vector<1x8x14xf32> to vector<8x14xf32>
    %304 = vector.shape_cast %301 : vector<8x14xf32> to vector<1x8x14xf32>
    tpu.vector_store %arg16[%c1_115, %c0_116, %c126_117], %304 {strides = array<i32>} : memref<2x8x196xf32, #tpu.memory_space<vmem>>, vector<1x8x14xf32>,
    %305 = vector.extract_strided_slice %264 {offsets = [0, 160], sizes = [8, 14], strides = [1, 1]} : vector<8x222xf32> to vector<8x14xf32>
    %c1_118 = arith.constant 1 : index
    %c0_119 = arith.constant 0 : index
    %c140_120 = arith.constant 140 : index
    %306 = vector.load %arg16[%c1_118, %c0_119, %c140_120] : memref<2x8x196xf32, #tpu.memory_space<vmem>>, vector<1x8x14xf32>
    %307 = vector.shape_cast %306 : vector<1x8x14xf32> to vector<8x14xf32>
    %308 = vector.shape_cast %305 : vector<8x14xf32> to vector<1x8x14xf32>
    tpu.vector_store %arg16[%c1_118, %c0_119, %c140_120], %308 {strides = array<i32>} : memref<2x8x196xf32, #tpu.memory_space<vmem>>, vector<1x8x14xf32>,
    %309 = vector.extract_strided_slice %264 {offsets = [0, 176], sizes = [8, 14], strides = [1, 1]} : vector<8x222xf32> to vector<8x14xf32>
    %c1_121 = arith.constant 1 : index
    %c0_122 = arith.constant 0 : index
    %c154_123 = arith.constant 154 : index
    %310 = vector.load %arg16[%c1_121, %c0_122, %c154_123] : memref<2x8x196xf32, #tpu.memory_space<vmem>>, vector<1x8x14xf32>
    %311 = vector.shape_cast %310 : vector<1x8x14xf32> to vector<8x14xf32>
    %312 = vector.shape_cast %309 : vector<8x14xf32> to vector<1x8x14xf32>
    tpu.vector_store %arg16[%c1_121, %c0_122, %c154_123], %312 {strides = array<i32>} : memref<2x8x196xf32, #tpu.memory_space<vmem>>, vector<1x8x14xf32>,
    %313 = vector.extract_strided_slice %264 {offsets = [0, 192], sizes = [8, 14], strides = [1, 1]} : vector<8x222xf32> to vector<8x14xf32>
    %c1_124 = arith.constant 1 : index
    %c0_125 = arith.constant 0 : index
    %c168_126 = arith.constant 168 : index
    %314 = vector.load %arg16[%c1_124, %c0_125, %c168_126] : memref<2x8x196xf32, #tpu.memory_space<vmem>>, vector<1x8x14xf32>
    %315 = vector.shape_cast %314 : vector<1x8x14xf32> to vector<8x14xf32>
    %316 = vector.shape_cast %313 : vector<8x14xf32> to vector<1x8x14xf32>
    tpu.vector_store %arg16[%c1_124, %c0_125, %c168_126], %316 {strides = array<i32>} : memref<2x8x196xf32, #tpu.memory_space<vmem>>, vector<1x8x14xf32>,
    %317 = vector.extract_strided_slice %264 {offsets = [0, 208], sizes = [8, 14], strides = [1, 1]} : vector<8x222xf32> to vector<8x14xf32>
    %c1_127 = arith.constant 1 : index
    %c0_128 = arith.constant 0 : index
    %c182_129 = arith.constant 182 : index
    %318 = vector.load %arg16[%c1_127, %c0_128, %c182_129] : memref<2x8x196xf32, #tpu.memory_space<vmem>>, vector<1x8x14xf32>
    %319 = vector.shape_cast %318 : vector<1x8x14xf32> to vector<8x14xf32>
    %320 = vector.shape_cast %317 : vector<8x14xf32> to vector<1x8x14xf32>
    tpu.vector_store %arg16[%c1_127, %c0_128, %c182_129], %320 {strides = array<i32>} : memref<2x8x196xf32, #tpu.memory_space<vmem>>, vector<1x8x14xf32>,
    return
  }
  func.func @transform_0(%arg0: i32) -> (i32, i32, i32) {
    %c0_i32 = arith.constant 0 : i32
    %c0_i32_0 = arith.constant 0 : i32
    %c0_i32_1 = arith.constant 0 : i32
    return %arg0, %c0_i32, %c0_i32_0 : i32, i32, i32
  }
  func.func @transform_1(%arg0: i32) -> (i32, i32) {
    %c0_i32 = arith.constant 0 : i32
    %c0_i32_0 = arith.constant 0 : i32
    %c0_i32_1 = arith.constant 0 : i32
    return %c0_i32, %c0_i32_0 : i32, i32
  }
  func.func @transform_2(%arg0: i32) -> (i32, i32) {
    %c0_i32 = arith.constant 0 : i32
    %c0_i32_0 = arith.constant 0 : i32
    %c0_i32_1 = arith.constant 0 : i32
    return %c0_i32, %c0_i32_0 : i32, i32
  }
  func.func @transform_3(%arg0: i32) -> (i32, i32) {
    %c0_i32 = arith.constant 0 : i32
    %c0_i32_0 = arith.constant 0 : i32
    %c0_i32_1 = arith.constant 0 : i32
    return %c0_i32, %c0_i32_0 : i32, i32
  }
  func.func @transform_4(%arg0: i32) -> (i32, i32) {
    %c0_i32 = arith.constant 0 : i32
    %c0_i32_0 = arith.constant 0 : i32
    %c0_i32_1 = arith.constant 0 : i32
    return %c0_i32, %c0_i32_0 : i32, i32
  }
  func.func @transform_5(%arg0: i32) -> (i32, i32) {
    %c0_i32 = arith.constant 0 : i32
    %c0_i32_0 = arith.constant 0 : i32
    %c0_i32_1 = arith.constant 0 : i32
    return %c0_i32, %c0_i32_0 : i32, i32
  }
  func.func @transform_6(%arg0: i32) -> (i32, i32) {
    %c0_i32 = arith.constant 0 : i32
    %c0_i32_0 = arith.constant 0 : i32
    %c0_i32_1 = arith.constant 0 : i32
    return %c0_i32, %c0_i32_0 : i32, i32
  }
  func.func @transform_7(%arg0: i32) -> (i32, i32) {
    %c0_i32 = arith.constant 0 : i32
    %c0_i32_0 = arith.constant 0 : i32
    %c0_i32_1 = arith.constant 0 : i32
    return %c0_i32, %c0_i32_0 : i32, i32
  }
  func.func @transform_8(%arg0: i32) -> (i32, i32) {
    %c0_i32 = arith.constant 0 : i32
    %c0_i32_0 = arith.constant 0 : i32
    %c0_i32_1 = arith.constant 0 : i32
    return %c0_i32, %c0_i32_0 : i32, i32
  }
  func.func @transform_9(%arg0: i32) -> (i32, i32) {
    %c0_i32 = arith.constant 0 : i32
    %c0_i32_0 = arith.constant 0 : i32
    %c0_i32_1 = arith.constant 0 : i32
    return %c0_i32, %c0_i32_0 : i32, i32
  }
  func.func @transform_10(%arg0: i32) -> (i32, i32) {
    %c0_i32 = arith.constant 0 : i32
    %c0_i32_0 = arith.constant 0 : i32
    %c0_i32_1 = arith.constant 0 : i32
    return %c0_i32, %c0_i32_0 : i32, i32
  }
  func.func @transform_11(%arg0: i32) -> (i32, i32) {
    %c0_i32 = arith.constant 0 : i32
    %c0_i32_0 = arith.constant 0 : i32
    %c0_i32_1 = arith.constant 0 : i32
    return %c0_i32, %c0_i32_0 : i32, i32
  }
  func.func @transform_12(%arg0: i32) -> (i32, i32) {
    %c0_i32 = arith.constant 0 : i32
    %c0_i32_0 = arith.constant 0 : i32
    %c0_i32_1 = arith.constant 0 : i32
    return %c0_i32, %c0_i32_0 : i32, i32
  }
  func.func @transform_13(%arg0: i32) -> (i32, i32) {
    %c0_i32 = arith.constant 0 : i32
    %c0_i32_0 = arith.constant 0 : i32
    %c0_i32_1 = arith.constant 0 : i32
    return %c0_i32, %c0_i32_0 : i32, i32
  }
  func.func @transform_14(%arg0: i32) -> (i32, i32) {
    %c0_i32 = arith.constant 0 : i32
    %c0_i32_0 = arith.constant 0 : i32
    %c0_i32_1 = arith.constant 0 : i32
    return %c0_i32, %c0_i32_0 : i32, i32
  }
  func.func @transform_15(%arg0: i32) -> (i32, i32, i32) {
    %c0_i32 = arith.constant 0 : i32
    %c0_i32_0 = arith.constant 0 : i32
    %c0_i32_1 = arith.constant 0 : i32
    return %arg0, %c0_i32, %c0_i32_0 : i32, i32, i32
  }
}

</mosaic_0001>

<bundles_post_ra>
// kernel: tpu_custom_call.1
= control target key start
LH: loop header
LB: loop body
LE: loop exit
PB: predicated region body
PF: predicated region fallthrough
CT: control target
= control target key end

     0   :  { %20 = vsyncpa [#allocation3], 0  ;;  %s3048_s0 = inlined_call_operand.vmem [shape: bf16[4,8,256], index: 0, kind: input, shape index: {}]   ;;  %s3049_s1 = inlined_call_operand.vmem [shape: bf16[16,8], index: 1, kind: input, shape index: {}]   ;;  %s3050_s2 = inlined_call_operand.vmem [shape: f32[16,1], index: 2, kind: input, shape index: {}]   ;;  %s3051_s3 = inlined_call_operand.vmem [shape: f32[16,1], index: 3, kind: input, shape index: {}]   ;;  %s3052_s4 = inlined_call_operand.vmem [shape: f32[16,9], index: 4, kind: input, shape index: {}]   ;;  %s3053_s5 = inlined_call_operand.vmem [shape: f32[16,1], index: 5, kind: input, shape index: {}]   ;;  %s3054_s6 = inlined_call_operand.vmem [shape: f32[16,1], index: 6, kind: input, shape index: {}]   ;;  %s3055_s7 = inlined_call_operand.vmem [shape: f32[1,222], index: 7, kind: input, shape index: {}]   ;;  %s3056_s8 = inlined_call_operand.vmem [shape: f32[2,16], index: 8, kind: input, shape index: {}]   ;;  %s3057_s9 = inlined_call_operand.vmem [shape: f32[2,1], index: 9, kind: input, shape index: {}]   ;;  %s3058_s10 = inlined_call_operand.vmem [shape: f32[16,2], index: 10, kind: input, shape index: {}]   ;;  %s3059_s11 = inlined_call_operand.vmem [shape: f32[16,1], index: 11, kind: input, shape index: {}]   ;;  %s3060_s12 = inlined_call_operand.vmem [shape: bf16[8,16], index: 12, kind: input, shape index: {}]   ;;  %s3061_s13 = inlined_call_operand.vmem [shape: f32[8,1], index: 13, kind: input, shape index: {}]   ;;  %s3062_s14 = inlined_call_operand.vmem [shape: f32[8,1], index: 14, kind: input, shape index: {}]   ;;  %s3063_s15 = inlined_call_operand.hbm [shape: f32[4,8,196], index: 15, kind: output, shape index: {}]  }
   0x1   :  { %22 = vsyncpa [#allocation3 + $0x1], 0  ;;  %s2361_s18 = smov 0   ;;  %s2363_s19 = smov 0  }
   0x2   :  { %s2365_s20 = smov 0   ;;  %s2367_s21 = smov 0  }
   0x3 LB: > { %3069 = sst [smem:[#allocation5_spill]] %s2234_s18  ;;  %s2382_s22 = sadd.s32 4294967295, %s2246_s21   ;;  %s2246_s21 = sphi %s2367_s21, %s3078_s21   ;;  %s2242_s20 = sphi %s2365_s20, %s3080_s20   ;;  %s2238_s19 = sphi %s2363_s19, %s3082_s19   ;;  %s2234_s18 = sphi %s2361_s18, %s3081_s18  }
   0x4   : > { %3070 = sst [smem:[#allocation6_spill]] %s2242_s20  ;;  %s1920_s23 = sadd.s32 4294967294, %s2246_s21  }
   0x5   : > { %s2386_s24 = sadd.s32 1, %s2246_s21   ;;  %s355_s25 = sadd.s32 1, %s2242_s20 }
   0x6   : > { %3071 = sst [smem:[#allocation7_spill]] %s2386_s24  ;;  %s352_s26 = ssub.s32 %s2246_s21, %s2386_s24 }
   0x7   : > { %p365_p0 = scmp.ne.s32.totalorder %s2242_s20, %s2238_s19  ;;  %p353_p1 = scmp.eq.s32.totalorder %s352_s26, 0 }
   0x8   : > { %p366_p2 = scmp.eq.s32.totalorder %s2382_s22, 1  ;;  %p371_p3 = scmp.ne.s32.totalorder %s2238_s19, %s2234_s18 }
   0x9   : > { %p372_p4 = scmp.eq.s32.totalorder %s1920_s23, 1  ;;  %p1923_p7 = scmp.ge.s32.totalorder %s2246_s21, 1 }
   0xa   : > { %s2397_s27 = scalar_select %p353_p1, %s2242_s20, %s355_s25  }
   0xb   : > { %p2399_p5 = por %p366_p2, %p365_p0  ;;  %p2403_p6 = por %p372_p4, %p371_p3 }
   0xc   : > { %3072 = sst [smem:[#allocation8_spill]] %s2397_s27  ;;  %p442_p8 = scmp.lt.s32.totalorder %s2246_s21, 3 }
   0xd   : > { %s3074_s29 = scalar_select %p2403_p6, 1, 0 }
   0xe   : > { %p443_p9 = pnand %p1923_p7, %p442_p8 }
   0xf   : > { %3075 = sst [smem:[#allocation9_spill]] %s3074_s29  ;;  %s1925_s30 = sshll.u32 (!%p443_p9), %s2382_s22, 1  ;;  %v2248_v0 = vmov (!%p443_p9), 0   ;;  %v2415_v1 = vld [vmem:[%s3052_s4] sm:$0xff] (!%p443_p9)  ;;  %v2249_v2 = vmov (!%p443_p9), 1   ;;  %v591_v4 = vld [vmem:[%s3051_s3 + $0x8] sm:$0xff] (!%p443_p9) }
  0x10   : > { %446 = sbr.rel (%p443_p9) target bundleno = 1726 (0x6be), region = 80  ;;  %p492_p10 = scmp.lt.s32.totalorder (!%p443_p9), %s1925_s30, 3  ;;  %563 = vmatprep.mubr.bf16.mxu0 (!%p443_p9), %v2248_v0  ;;  %1056 = vmatprep.mubr.bf16.mxu1 (!%p443_p9), %v2248_v0  ;;  %v590_v3 = vld [vmem:[%s3051_s3] sm:$0xff] (!%p443_p9)  ;;  %v2429_v5 = vld [vmem:[%s3052_s4 + $0x8] sm:$0xff] (!%p443_p9)  ;;  %vm524_vm0 = vcmask (!%p443_p9), 1043456   ;;  %v2250_v8 = vmov (!%p443_p9), 2  }
  0x11   : > { %2081 = vset.pattern.permute.xlu0 (!%p443_p9), %v2249_v2  ;;  %2080 = vset.pattern.permute.xlu1 (!%p443_p9), %v2248_v0  ;;  %v2106_v14 = vld [vmem:[%s3049_s1] sm:$0xff] (!%p443_p9)   ;;  %vm520_vm1 = vcmask (!%p443_p9), 64512   ;;  %v2251_v16 = vmov (!%p443_p9), 4   ;;  %v2252_v17 = vmov (!%p443_p9), 5   ;;  %v2253_v18 = vmov (!%p443_p9), 7   ;;  %v575_v22 = vld [vmem:[%s3050_s2 + $0x8] sm:$0xff] (!%p443_p9) }
  0x12   : > { %653 = vperm.xlu0 (!%p443_p9), %2081, %v2415_v1   ;;  %594 = vperm.xlu1 (!%p443_p9), %2080, %v590_v3   ;;  %v2254_v19 = vmov (!%p443_p9), 3   ;;  %v2255_v20 = vmov (!%p443_p9), 8   ;;  %v574_v21 = vld [vmem:[%s3050_s2] sm:$0xff] (!%p443_p9)  ;;  %v2256_v24 = vmov (!%p443_p9), 6   ;;  %v505_v25 = vld [vmem:[%s3054_s6 + $0x8] sm:$0xff] (!%p443_p9)  ;;  %s2258_s23 = smov (!%p443_p9), 127  }
  0x13   : > { %v502_v23 = vld [vmem:[%s3053_s5] sm:$0xff] (!%p443_p9)  ;;  %v503_v26 = vld [vmem:[%s3053_s5 + $0x8] sm:$0xff] (!%p443_p9)  ;;  %s2259_s25 = smov (!%p443_p9), 95   ;;  %s2260_s26 = smov (!%p443_p9), 126   ;;  %vm676_vm2 = vcmask (!%p443_p9), 1039360   ;;  %vm711_vm3 = vcmask (!%p443_p9), 1031168  }
  0x14   : > { %v504_v27 = vld [vmem:[%s3054_s6] sm:$0xff] (!%p443_p9)  ;;  %s2262_s17 = smov (!%p443_p9), 112   ;;  %s2263_s20 = smov (!%p443_p9), 111   ;;  %vm746_vm4 = vcmask (!%p443_p9), 916480   ;;  %vm781_vm5 = vcmask (!%p443_p9), 908288   ;;  %vm816_vm6 = vcmask (!%p443_p9), 900096  }
  0x15   : > { %s2264_s24 = smov (!%p443_p9), 110   ;;  %vm851_vm7 = vcmask (!%p443_p9), 785408   ;;  %vm886_vm8 = vcmask (!%p443_p9), 777216   ;;  %vm921_vm9 = vcmask (!%p443_p9), 769024   ;;  %vm2266_vm10 = vmmov (!%p443_p9), 0   ;;  %s2268_s29 = smov (!%p443_p9), 122  }
  0x16   : > { %2084 = vset.pattern.permute.xlu0 (!%p443_p9), %v2250_v8  ;;  %599 = vperm.xlu1 (!%p443_p9), %2080, %v591_v4   ;;  %vm1367_vm11 = vcmask (!%p443_p9), 7168   ;;  %vm1377_vm12 = vcmask (!%p443_p9), 130048   ;;  %vm1472_vm13 = vcmask (!%p443_p9), 15360   ;;  %vm1479_vm14 = vcmask (!%p443_p9), 1041408  }
  0x17   : > { %s3084_s30 = smov (!%p492_p10, %s1925_s30), 3  ;;  %692 = vperm.xlu0 %2084, %v2429_v5   ;;  %vm1651_vm15 = vcmask 113664  }
  0x18   : > { %s1985_s16 = sshll.u32 %s3084_s30, 3  ;;  %s2257_s30 = smov 96  }
  0x19   : > { %s2434_s18 = scalar_lea.vmem %s3048_s0, %s1985_s16  ;;  %s2261_s16 = smov 94  }
  0x1a   : > { %v507_v6 = vld [vmem:[%s2434_s18] sm:$0xff]  ;;  %v1941_v7 = vld [vmem:[%s2434_s18 + $0x8] sm:$0xff]  ;;  %2082 = vset.pattern.permute.xlu1 %v2249_v2 }
  0x1b   : > { %v1930_v9 = vcombine.high %v507_v6, %v507_v6  ;;  %v1943_v10 = vcombine.high %v1941_v7, %v1941_v7  ;;  %v1929_v11 = vcombine.low %v507_v6, %v507_v6  ;;  %v1942_v12 = vcombine.low %v1941_v7, %v1941_v7  ;;  %2086 = vset.pattern.permute.xlu0 %v2251_v16 }
  0x1c   : > { %758 = vperm.xlu0 %2086, %v2415_v1   ;;  %657 = vperm.xlu1 %2082, %v2429_v5  }
  0x1d   : > { %1931 = vmatprep.subr.msk.bf16.mxu0 %vm524_vm0, %v1930_v9  ;;  %1944 = vmatprep.subr.msk.bf16.mxu1 %vm524_vm0, %v1943_v10  ;;  %v526_v13 = vsel %vm524_vm0, %v1929_v11, 0  ;;  %v1019_v15 = vsel %vm524_vm0, %v1942_v12, 0  ;;  %vm1657_vm0 = vcmask 228464  }
  0x1e   : > { %532 = vmatpush1.bf16.msra.mxu0 %v526_v13  ;;  %1025 = vmatpush1.bf16.msra.mxu1 %v1019_v15 }
  0x20   : > { %2089 = vset.pattern.permute.xlu0 %v2252_v17  ;;  %2083 = vset.pattern.permute.xlu1 %v2250_v8 }
  0x21   : > { %1932 = vmatmul.mubr.msk.bf16.vlgmr.msra.gmra.mrb[0].mxu0 %vm520_vm1, %v2106_v14  ;;  %1945 = vmatmul.mubr.msk.bf16.vlgmr.msra.gmra.mrb[0].mxu1 %vm520_vm1, %v2106_v14  ;;  %vm1662_vm1 = vcmask 343264  }
  0x22   : > { %797 = vperm.xlu0 %2089, %v2429_v5   ;;  %688 = vperm.xlu1 %2083, %v2415_v1  }
  0x26   : > { %2091 = vset.pattern.permute.xlu0 %v2253_v18  ;;  %2085 = vset.pattern.permute.xlu1 %v2254_v19 }
  0x27   : > { %863 = vperm.xlu0 %2091, %v2415_v1   ;;  %723 = vperm.xlu1 %2085, %v2415_v1  }
  0x2b   : > { %2094 = vset.pattern.permute.xlu0 %v2255_v20  ;;  %727 = vperm.xlu1 %2085, %v2429_v5  }
  0x2c   : > { %902 = vperm.xlu0 %2094, %v2429_v5  }
  0x2f   : > { %2087 = vset.pattern.permute.xlu1 %v2251_v16 }
  0x30   : > { %2095 = vset.pattern.permute.xlu0 %v2248_v0  ;;  %762 = vperm.xlu1 %2087, %v2429_v5  }
  0x31   : > { %578 = vperm.xlu0 %2095, %v574_v21  }
  0x34   : > { %2088 = vset.pattern.permute.xlu1 %v2252_v17 }
  0x35   : > { %583 = vperm.xlu0 %2095, %v575_v22   ;;  %793 = vperm.xlu1 %2088, %v2415_v1  }
  0x39   : > { %934 = vperm.xlu0 %2095, %v502_v23   ;;  %2090 = vset.pattern.permute.xlu1 %v2256_v24 }
  0x3a   : > { %828 = vperm.xlu1 %2090, %v2415_v1  }
  0x3d   : > { %953 = vperm.xlu0 %2095, %v505_v25  }
  0x3e   : > { %832 = vperm.xlu1 %2090, %v2429_v5  }
  0x42   : > { %2092 = vset.pattern.permute.xlu1 %v2253_v18 }
  0x43   : > { %867 = vperm.xlu1 %2092, %v2429_v5  }
  0x47   : > { %2093 = vset.pattern.permute.xlu1 %v2255_v20 }
  0x48   : > { %898 = vperm.xlu1 %2093, %v2415_v1  }
  0x4c   : > { %2096 = vset.pattern.permute.xlu1 %v2248_v0 }
  0x4d   : > { %636 = vperm.xlu1 %2096, %v2415_v1  }
  0x51   : > { %641 = vperm.xlu1 %2096, %v2429_v5  }
  0x55   : > { %939 = vperm.xlu1 %2096, %v503_v26  }
  0x59   : > { %948 = vperm.xlu1 %2096, %v504_v27  }
  0x91   : > { %v2479_v28 = vpop.permute.xlu0 %653  ;;  %v595_v31 = vpop.permute.xlu1 %594 }
  0x95   : > { %v2487_v33 = vpop.permute.xlu1 %599 }
  0x96   : > { %v2481_v29 = vpop.permute.xlu0 %692 }
  0x9b   : > { %v2483_v30 = vpop.permute.xlu0 %758  ;;  %v2491_v35 = vpop.permute.xlu1 %657 }
  0xa1   : > { %v2485_v32 = vpop.permute.xlu0 %797  ;;  %v2495_v37 = vpop.permute.xlu1 %688 }
  0xa6   : > { %v2489_v34 = vpop.permute.xlu0 %863  ;;  %v2503_v52 = vpop.permute.xlu1 %723 }
  0xaa   : > { %v2505_v57 = vpop.permute.xlu1 %727 }
  0xab   : > { %v2493_v36 = vpop.permute.xlu0 %902 }
  0xaf   : > { %v2507_v63 = vpop.permute.xlu1 %762 }
  0xb0   : > { %v579_v38 = vpop.permute.xlu0 %578 }
  0xb4   : > { %v2509_v4 = vpop.permute.xlu1 %793  ;;  %v584_v25 = vpop.permute.xlu0 %583 }
  0xb9   : > { %v2511_v7 = vpop.permute.xlu1 %828 }
  0xbd   : > { %v2523_v16 = vpop.permute.xlu1 %832 }
  0xc2   : > { %v2535_v21 = vpop.permute.xlu1 %867 }
  0xc7   : > { %v2545_v27 = vpop.permute.xlu1 %898 }
  0xf4   : > { %v565_v39 = vpop.f32.mrb[0].mxu0  ;;  %v1058_v41 = vpop.f32.mrb[0].mxu1 }
  0xf5   : > { %v586_v40 = vmul.f32 %v579_v38, %v565_v39  ;;  %v567_v42 = vpop.f32.mrb[1].mxu0  ;;  %v1067_v43 = vmul.f32 %v1058_v41, %v579_v38  ;;  %v1060_v44 = vpop.f32.mrb[1].mxu1 }
  0xf6   : > { %v569_v45 = vpop.f32.mrb[2].mxu0  ;;  %v2497_v47 = vpop.f32.mrb[2].mxu1  ;;  %v587_v54 = vmul.f32 %v579_v38, %v567_v42  ;;  %v1068_v56 = vmul.f32 %v1060_v44, %v579_v38 }
  0xf7   : > { %v602_v46 = vadd.f32 %v595_v31, %v586_v40  ;;  %v2499_v48 = vpop.f32.mrb[3].mxu0  ;;  %v1071_v49 = vadd.f32 %v1067_v43, %v595_v31  ;;  %v2501_v50 = vpop.f32.mrb[3].mxu1  ;;  %v588_v26 = vmul.f32 %v584_v25, %v569_v45  ;;  %v1069_v42 = vmul.f32 %v2497_v47, %v584_v25 }
  0xf8   : > { %v603_v55 = vadd.f32 %v595_v31, %v587_v54  ;;  %v1072_v59 = vadd.f32 %v1068_v56, %v595_v31 }
  0xf9   : > { %v1933_v51 = vmul.f32 -1.442695, %v602_v46  ;;  %v1946_v53 = vmul.f32 -1.442695, %v1071_v49  ;;  %v2554_v41 = vadd.f32 %v2487_v33, %v588_v26 }
  0xfa   : > { %v1934_v58 = vmul.f32 -1.442695, %v603_v55  ;;  %v1947_v3 = vmul.f32 -1.442695, %v1072_v59 }
  0xfb   : > { %2107 = vpow2.f32 %v1933_v51 }
  0xfc   : > { %2109 = vpow2.f32 %v1946_v53 }
  0xfd   : > { %2111 = vpow2.f32 %v1934_v58  ;;  %v589_v58 = vmul.f32 %v584_v25, %v2499_v48 }
 0x105   : > { %v2108_v60 = vpop.eup %2107 }
 0x106   : > { %v2110_v61 = vpop.eup %2109  ;;  %v618_v62 = vadd.f32 1.0, %v2108_v60 }
 0x107   : > { %v1087_v1 = vadd.f32 1.0, %v2110_v61  ;;  %v2112_v5 = vpop.eup %2111 }
 0x108   : > { %2113 = vrcp.f32 %v618_v62  ;;  %v619_v10 = vadd.f32 1.0, %v2112_v5  ;;  %v605_v62 = vadd.f32 %v2487_v33, %v589_v58 }
 0x109   : > { %2115 = vrcp.f32 %v1087_v1  ;;  %v1070_v1 = vmul.f32 %v2501_v50, %v584_v25 }
 0x10a   : > { %2117 = vpow2.f32 %v1947_v3 }
 0x10b   : > { %2119 = vrcp.f32 %v619_v10 }
 0x112   : > { %v2114_v6 = vpop.eup %2113 }
 0x113   : > { %v2116_v8 = vpop.eup %2115  ;;  %v2513_v9 = vmul.f32 %v2114_v6, %v602_v46  ;;  %v1935_v46 = vmul.f32 -1.442695, %v2554_v41  ;;  %v1936_v6 = vmul.f32 -1.442695, %v605_v62 }
 0x114   : > { %v2118_v11 = vpop.eup %2117  ;;  %v2515_v12 = vmul.f32 %v2116_v8, %v1071_v49  ;;  %v2567_v49 = vadd.f32 %v1069_v42, %v2487_v33  ;;  %v1074_v8 = vadd.f32 %v1070_v1, %v2487_v33 }
 0x115   : > { %v835_v13 = vmul.f32 %v2511_v7, %v2513_v9  ;;  %v660_v14 = vmul.f32 %v2479_v28, %v2513_v9  ;;  %v1088_v15 = vadd.f32 1.0, %v2118_v11  ;;  %v870_v19 = vmul.f32 %v2489_v34, %v2513_v9  ;;  %v2120_v24 = vpop.eup %2119 }
 0x116   : > { %v1241_v17 = vmul.f32 %v2515_v12, %v2511_v7  ;;  %v1111_v18 = vmul.f32 %v2515_v12, %v2479_v28  ;;  %v695_v20 = vmul.f32 %v2495_v37, %v2513_v9  ;;  %v1267_v22 = vmul.f32 %v2515_v12, %v2489_v34 }
 0x117   : > { %843 = vrot.lane.b32.xlu1 %v835_v13, %s2257_s30  ;;  %668 = vrot.lane.b32.xlu0 %v660_v14, %s2258_s23  ;;  %2121 = vrcp.f32 %v1088_v15  ;;  %v1137_v23 = vmul.f32 %v2515_v12, %v2495_v37  ;;  %v2547_v31 = vmul.f32 %v2120_v24, %v603_v55  ;;  %v905_v38 = vmul.f32 %v2545_v27, %v2513_v9 }
 0x118   : > { %v730_v39 = vmul.f32 %v2503_v52, %v2513_v9  ;;  %v1163_v44 = vmul.f32 %v2515_v12, %v2503_v52  ;;  %v765_v47 = vmul.f32 %v2483_v30, %v2513_v9  ;;  %2123 = vpow2.f32 %v1935_v46 }
 0x119   : > { %v661_v45 = vmul.f32 %v2479_v28, %v2547_v31  ;;  %v1948_v53 = vmul.f32 -1.442695, %v2567_v49  ;;  %v1189_v54 = vmul.f32 %v2515_v12, %v2483_v30  ;;  %v696_v55 = vmul.f32 %v2495_v37, %v2547_v31 }
 0x11a   : > { %v1215_v60 = vmul.f32 %v2515_v12, %v2509_v4  ;;  %v731_v61 = vmul.f32 %v2503_v52, %v2547_v31  ;;  %v836_v3 = vmul.f32 %v2511_v7, %v2547_v31  ;;  %v766_v11 = vmul.f32 %v2483_v30, %v2547_v31 }
 0x11b   : > { %1249 = vrot.lane.b32.xlu1 %v1241_v17, %s2257_s30  ;;  %1119 = vrot.lane.b32.xlu0 %v1111_v18, %s2258_s23  ;;  %2125 = vpow2.f32 %v1948_v53  ;;  %v1949_v13 = vmul.f32 -1.442695, %v1074_v8  ;;  %v871_v33 = vmul.f32 %v2489_v34, %v2547_v31  ;;  %v801_v14 = vmul.f32 %v2509_v4, %v2547_v31 }
 0x11f   : > { %878 = vrot.lane.b32.xlu1 %v870_v19, %s2259_s25  ;;  %703 = vrot.lane.b32.xlu0 %v695_v20, %s2260_s26 }
 0x121   : > { %v2122_v40 = vpop.eup %2121 }
 0x122   : > { %v2559_v43 = vmul.f32 %v2122_v40, %v1072_v59  ;;  %v2124_v59 = vpop.eup %2123 }
 0x123   : > { %1275 = vrot.lane.b32.xlu1 %v1267_v22, %s2259_s25  ;;  %1145 = vrot.lane.b32.xlu0 %v1137_v23, %s2260_s26 }
 0x124   : > { %v1112_v51 = vmul.f32 %v2559_v43, %v2479_v28  ;;  %v800_v28 = vmul.f32 %v2509_v4, %v2513_v9  ;;  %v1138_v56 = vmul.f32 %v2559_v43, %v2495_v37  ;;  %v620_v37 = vadd.f32 1.0, %v2124_v59 }
 0x125   : > { %v2126_v48 = vpop.eup %2125  ;;  %v1164_v5 = vmul.f32 %v2559_v43, %v2503_v52  ;;  %v1242_v10 = vmul.f32 %v2559_v43, %v2511_v7  ;;  %v1190_v52 = vmul.f32 %v2559_v43, %v2483_v30  ;;  %v1268_v7 = vmul.f32 %v2559_v43, %v2489_v34 }
 0x126   : > { %2127 = vrcp.f32 %v620_v37  ;;  %v1089_v50 = vadd.f32 1.0, %v2126_v48  ;;  %v906_v30 = vmul.f32 %v2545_v27, %v2547_v31  ;;  %v1216_v19 = vmul.f32 %v2559_v43, %v2509_v4 }
 0x127   : > { %913 = vrot.lane.b32.xlu1 %v905_v38, %s2261_s16  ;;  %738 = vrot.lane.b32.xlu0 %v730_v39, %s2262_s17  ;;  %2129 = vpow2.f32 %v1936_v6  ;;  %v1294_v1 = vmul.f32 %v2559_v43, %v2545_v27 }
 0x128   : > { %2131 = vrcp.f32 %v1089_v50 }
 0x129   : > { %2133 = vpow2.f32 %v1949_v13 }
 0x12b   : > { %1171 = vrot.lane.b32.xlu0 %v1163_v44, %s2262_s17  ;;  %670 = vrot.lane.b32.xlu1 %v661_v45, %s2258_s23 }
 0x12f   : > { %773 = vrot.lane.b32.xlu0 %v765_v47, %s2263_s20  ;;  %1121 = vrot.lane.b32.xlu1 %v1112_v51, %s2258_s23 }
 0x130   : > { %v2128_v15 = vpop.eup %2127 }
 0x131   : > { %v2130_v17 = vpop.eup %2129  ;;  %v2625_v18 = vmul.f32 %v2128_v15, %v2554_v41 }
 0x132   : > { %v2132_v20 = vpop.eup %2131  ;;  %v621_v34 = vadd.f32 1.0, %v2130_v17  ;;  %v1293_v17 = vmul.f32 %v2515_v12, %v2545_v27 }
 0x133   : > { %1197 = vrot.lane.b32.xlu0 %v1189_v54, %s2263_s20  ;;  %705 = vrot.lane.b32.xlu1 %v696_v55, %s2260_s26  ;;  %v2134_v22 = vpop.eup %2133  ;;  %v2634_v23 = vmul.f32 %v2132_v20, %v2567_v49  ;;  %v837_v24 = vmul.f32 %v2523_v16, %v2625_v18  ;;  %v662_v25 = vmul.f32 %v2491_v35, %v2625_v18 }
 0x134   : > { %2135 = vrcp.f32 %v621_v34  ;;  %v1090_v4 = vadd.f32 1.0, %v2134_v22  ;;  %v872_v39 = vmul.f32 %v2535_v21, %v2625_v18  ;;  %v697_v40 = vmul.f32 %v2481_v29, %v2625_v18 }
 0x135   : > { %v1243_v26 = vmul.f32 %v2634_v23, %v2523_v16  ;;  %v1113_v38 = vmul.f32 %v2634_v23, %v2491_v35  ;;  %v1269_v41 = vmul.f32 %v2634_v23, %v2535_v21  ;;  %v1139_v42 = vmul.f32 %v2634_v23, %v2481_v29 }
 0x136   : > { %2137 = vrcp.f32 %v1090_v4  ;;  %v907_v46 = vmul.f32 %v2493_v36, %v2625_v18  ;;  %v732_v49 = vmul.f32 %v2505_v57, %v2625_v18  ;;  %v1165_v53 = vmul.f32 %v2634_v23, %v2505_v57 }
 0x137   : > { %808 = vrot.lane.b32.xlu0 %v800_v28, %s2264_s24  ;;  %1147 = vrot.lane.b32.xlu1 %v1138_v56, %s2260_s26  ;;  %v767_v55 = vmul.f32 %v2507_v63, %v2625_v18  ;;  %v1191_v56 = vmul.f32 %v2634_v23, %v2507_v63  ;;  %v802_v59 = vmul.f32 %v2485_v32, %v2625_v18 }
 0x13b   : > { %1223 = vrot.lane.b32.xlu0 %v1215_v60, %s2264_s24  ;;  %740 = vrot.lane.b32.xlu1 %v731_v61, %s2262_s17  ;;  %v2694_v60 = vpop.permute.xlu1 %636  ;;  %v1217_v61 = vmul.f32 %v2634_v23, %v2485_v32 }
 0x13c   : > { %v1104_v4 = vmul.f32 %v2559_v43, %v2694_v60 }
 0x13e   : > { %v2136_v44 = vpop.eup %2135 }
 0x13f   : > { %845 = vrot.lane.b32.xlu0 %v836_v3, %s2257_s30  ;;  %1173 = vrot.lane.b32.xlu1 %v1164_v5, %s2262_s17  ;;  %v2660_v45 = vmul.f32 %v2136_v44, %v605_v62  ;;  %v2706_v37 = vpop.permute.xlu1 %641  ;;  %v2714_v5 = vpop.permute.xlu0 %934 }
 0x140   : > { %v2138_v47 = vpop.eup %2137 }
 0x141   : > { %v2668_v51 = vmul.f32 %v2138_v47, %v1074_v8  ;;  %v663_v54 = vmul.f32 %v2491_v35, %v2660_v45  ;;  %v698_v58 = vmul.f32 %v2481_v29, %v2660_v45  ;;  %v733_v62 = vmul.f32 %v2505_v57, %v2660_v45 }
 0x142   : > { %v838_v48 = vmul.f32 %v2523_v16, %v2660_v45  ;;  %v768_v3 = vmul.f32 %v2507_v63, %v2660_v45  ;;  %v803_v13 = vmul.f32 %v2485_v32, %v2660_v45  ;;  %v908_v15 = vmul.f32 %v2493_v36, %v2660_v45 }
 0x143   : > { %1251 = vrot.lane.b32.xlu0 %v1242_v10, %s2257_s30  ;;  %775 = vrot.lane.b32.xlu1 %v766_v11, %s2263_s20  ;;  %v1114_v28 = vmul.f32 %v2668_v51, %v2491_v35  ;;  %v1140_v35 = vmul.f32 %v2668_v51, %v2481_v29  ;;  %v1166_v29 = vmul.f32 %v2668_v51, %v2505_v57  ;;  %v2716_v6 = vpop.permute.xlu1 %939  ;;  %v2726_v50 = vpop.permute.xlu0 %953 }
 0x144   : > { %v1244_v57 = vmul.f32 %v2668_v51, %v2523_v16  ;;  %v1192_v8 = vmul.f32 %v2668_v51, %v2507_v63  ;;  %v873_v11 = vmul.f32 %v2535_v21, %v2660_v45 }
 0x147   : > { %880 = vrot.lane.b32.xlu0 %v871_v33, %s2259_s25  ;;  %1199 = vrot.lane.b32.xlu1 %v1190_v52, %s2263_s20  ;;  %v2728_v10 = vpop.permute.xlu1 %948  ;;  %v1270_v33 = vmul.f32 %v2668_v51, %v2535_v21  ;;  %v1218_v52 = vmul.f32 %v2668_v51, %v2485_v32 }
 0x14b   : > { %1277 = vrot.lane.b32.xlu0 %v1268_v7, %s2259_s25  ;;  %810 = vrot.lane.b32.xlu1 %v801_v14, %s2264_s24 }
 0x14f   : > { %915 = vrot.lane.b32.xlu0 %v906_v30, %s2261_s16  ;;  %1225 = vrot.lane.b32.xlu1 %v1216_v19, %s2264_s24  ;;  %v1296_v30 = vmul.f32 %v2668_v51, %v2493_v36  ;;  %v1295_v19 = vmul.f32 %v2634_v23, %v2493_v36  ;;  %v1103_v36 = vmul.f32 %v2515_v12, %v2694_v60 }
 0x153   : > { %847 = vrot.lane.b32.xlu1 %v837_v24, %s2257_s30  ;;  %672 = vrot.lane.b32.xlu0 %v662_v25, %s2258_s23 }
 0x157   : > { %1253 = vrot.lane.b32.xlu1 %v1243_v26, %s2257_s30  ;;  %1123 = vrot.lane.b32.xlu0 %v1113_v38, %s2258_s23 }
 0x15b   : > { %882 = vrot.lane.b32.xlu1 %v872_v39, %s2259_s25  ;;  %707 = vrot.lane.b32.xlu0 %v697_v40, %s2260_s26 }
 0x15f   : > { %1279 = vrot.lane.b32.xlu1 %v1269_v41, %s2259_s25  ;;  %1149 = vrot.lane.b32.xlu0 %v1139_v42, %s2260_s26 }
 0x163   : > { %917 = vrot.lane.b32.xlu1 %v907_v46, %s2261_s16  ;;  %742 = vrot.lane.b32.xlu0 %v732_v49, %s2262_s17 }
 0x167   : > { %1175 = vrot.lane.b32.xlu0 %v1165_v53, %s2262_s17  ;;  %674 = vrot.lane.b32.xlu1 %v663_v54, %s2258_s23 }
 0x16b   : > { %777 = vrot.lane.b32.xlu0 %v767_v55, %s2263_s20  ;;  %1125 = vrot.lane.b32.xlu1 %v1114_v28, %s2258_s23  ;;  %s2270_s23 = smov 120  }
 0x16f   : > { %1201 = vrot.lane.b32.xlu0 %v1191_v56, %s2263_s20  ;;  %709 = vrot.lane.b32.xlu1 %v698_v58, %s2260_s26 }
 0x173   : > { %812 = vrot.lane.b32.xlu0 %v802_v59, %s2264_s24  ;;  %1151 = vrot.lane.b32.xlu1 %v1140_v35, %s2260_s26  ;;  %v645_v35 = vmul.f32 %v2694_v60, %v2547_v31 }
 0x177   : > { %1227 = vrot.lane.b32.xlu0 %v1217_v61, %s2264_s24  ;;  %744 = vrot.lane.b32.xlu1 %v733_v62, %s2262_s17  ;;  %v644_v62 = vmul.f32 %v2694_v60, %v2513_v9 }
 0x17b   : > { %1303 = vrot.lane.b32.xlu0 %v1294_v1, %s2261_s16  ;;  %1177 = vrot.lane.b32.xlu1 %v1166_v29, %s2262_s17 }
 0x17f   : > { %849 = vrot.lane.b32.xlu0 %v838_v48, %s2257_s30  ;;  %779 = vrot.lane.b32.xlu1 %v768_v3, %s2263_s20 }
 0x183   : > { %1255 = vrot.lane.b32.xlu0 %v1244_v57, %s2257_s30  ;;  %1203 = vrot.lane.b32.xlu1 %v1192_v8, %s2263_s20  ;;  %s488_s20 = sand.u32 1, %s2238_s19  }
 0x184   : > { %s1924_s27 = sshll.u32 %s488_s20, 5 }
 0x185   : > { %s2957_s30 = scalar_lea.vmem [#allocation2], %s1924_s27  ;;  %s2274_s27 = smov 114  }
 0x187   : > { %884 = vrot.lane.b32.xlu0 %v873_v11, %s2259_s25  ;;  %814 = vrot.lane.b32.xlu1 %v803_v13, %s2264_s24 }
 0x189   : > { %v2736_v16 = vpop.permute.xlu1 %843  ;;  %v669_v63 = vpop.permute.xlu0 %668 }
 0x18b   : > { %1281 = vrot.lane.b32.xlu0 %v1270_v33, %s2259_s25  ;;  %1229 = vrot.lane.b32.xlu1 %v1218_v52, %s2264_s24  ;;  %s2271_s25 = smov 118  }
 0x18d   : > { %v2744_v7 = vpop.permute.xlu1 %1249  ;;  %v1120_v14 = vpop.permute.xlu0 %1119 }
 0x18f   : > { %919 = vrot.lane.b32.xlu0 %v908_v15, %s2261_s16  ;;  %1301 = vrot.lane.b32.xlu1 %v1293_v17, %s2261_s16 }
 0x191   : > { %v2752_v21 = vpop.permute.xlu1 %878  ;;  %v704_v32 = vpop.permute.xlu0 %703 }
 0x193   : > { %1307 = vrot.lane.b32.xlu0 %v1296_v30, %s2261_s16  ;;  %1305 = vrot.lane.b32.xlu1 %v1295_v19, %s2261_s16  ;;  %s2273_s16 = smov 108  }
 0x195   : > { %v2760_v20 = vpop.permute.xlu1 %1275  ;;  %v1146_v27 = vpop.permute.xlu0 %1145 }
 0x199   : > { %v2762_v34 = vpop.permute.xlu1 %913  ;;  %v739_v22 = vpop.permute.xlu0 %738 }
 0x19d   : > { %v1172_v24 = vpop.permute.xlu0 %1171  ;;  %v671_v25 = vpop.permute.xlu1 %670 }
 0x19e   : > { %v677_v61 = vsel %vm676_vm2, %v669_v63, %v671_v25  ;;  %v684_v48 = vadd.f32 %v671_v25, %v645_v35 }
 0x19f   : > { %v683_v57 = vadd.f32 %v677_v61, %v644_v62 }
 0x1a1   : > { %v774_v26 = vpop.permute.xlu0 %773  ;;  %v1122_v38 = vpop.permute.xlu1 %1121 }
 0x1a2   : > { %v1127_v39 = vsel %vm676_vm2, %v1120_v14, %v1122_v38  ;;  %v1134_v40 = vadd.f32 %v1122_v38, %v1104_v4 }
 0x1a3   : > { %v1133_v41 = vadd.f32 %v1127_v39, %v1103_v36 }
 0x1a5   : > { %v1198_v42 = vpop.permute.xlu0 %1197  ;;  %v706_v44 = vpop.permute.xlu1 %705 }
 0x1a6   : > { %v712_v3 = vsel %vm711_vm3, %v704_v32, %v706_v44  ;;  %v719_v8 = vadd.f32 %v706_v44, %v684_v48 }
 0x1a7   : > { %v718_v13 = vadd.f32 %v712_v3, %v683_v57 }
 0x1a9   : > { %v809_v46 = vpop.permute.xlu0 %808  ;;  %v1148_v49 = vpop.permute.xlu1 %1147 }
 0x1aa   : > { %v1153_v47 = vsel %vm711_vm3, %v1146_v27, %v1148_v49  ;;  %v1160_v53 = vadd.f32 %v1148_v49, %v1134_v40 }
 0x1ab   : > { %v1159_v54 = vadd.f32 %v1153_v47, %v1133_v41 }
 0x1ad   : > { %v1224_v43 = vpop.permute.xlu0 %1223  ;;  %v741_v55 = vpop.permute.xlu1 %740 }
 0x1ae   : > { %v747_v11 = vsel %vm746_vm4, %v739_v22, %v741_v55  ;;  %v754_v14 = vadd.f32 %v741_v55, %v719_v8 }
 0x1af   : > { %v753_v9 = vadd.f32 %v747_v11, %v718_v13  ;;  %v989_v13 = vlaneseq }
 0x1b1   : > { %v846_v28 = vpop.permute.xlu0 %845  ;;  %v1174_v56 = vpop.permute.xlu1 %1173 }
 0x1b2   : > { %v1179_v12 = vsel %vm746_vm4, %v1172_v24, %v1174_v56  ;;  %v1186_v58 = vadd.f32 %v1174_v56, %v1160_v53  ;;  %v852_v25 = vsel %vm851_vm7, %v2736_v16, %v846_v28 }
 0x1b3   : > { %v1185_v59 = vadd.f32 %v1179_v12, %v1159_v54 }
 0x1b5   : > { %v1252_v1 = vpop.permute.xlu0 %1251  ;;  %v776_v29 = vpop.permute.xlu1 %775 }
 0x1b6   : > { %v782_v31 = vsel %vm781_vm5, %v774_v26, %v776_v29  ;;  %v789_v17 = vadd.f32 %v776_v29, %v754_v14  ;;  %v1257_v49 = vsel %vm851_vm7, %v2744_v7, %v1252_v1 }
 0x1b7   : > { %v788_v32 = vadd.f32 %v782_v31, %v753_v9 }
 0x1b9   : > { %v881_v33 = vpop.permute.xlu0 %880  ;;  %v1200_v52 = vpop.permute.xlu1 %1199 }
 0x1ba   : > { %v1205_v63 = vsel %vm781_vm5, %v1198_v42, %v1200_v52  ;;  %v1212_v15 = vadd.f32 %v1200_v52, %v1186_v58  ;;  %v887_v39 = vsel %vm886_vm8, %v2752_v21, %v881_v33 }
 0x1bb   : > { %v1211_v60 = vadd.f32 %v1205_v63, %v1185_v59 }
 0x1bd   : > { %v1278_v30 = vpop.permute.xlu0 %1277  ;;  %v811_v19 = vpop.permute.xlu1 %810 }
 0x1be   : > { %v817_v27 = vsel %vm816_vm6, %v809_v46, %v811_v19  ;;  %v824_v22 = vadd.f32 %v811_v19, %v789_v17  ;;  %v1283_v21 = vsel %vm886_vm8, %v2760_v20, %v1278_v30 }
 0x1bf   : > { %v823_v24 = vadd.f32 %v817_v27, %v788_v32  ;;  %v506_v27 = vld [vmem:[%s3055_s7] sm:$0x3] }
 0x1c0   : > { %v859_v4 = vadd.f32 %v846_v28, %v824_v22 }
 0x1c1   : > { %v858_v26 = vadd.f32 %v852_v25, %v823_v24  ;;  %v916_v36 = vpop.permute.xlu0 %915  ;;  %v1226_v38 = vpop.permute.xlu1 %1225 }
 0x1c2   : > { %v894_v40 = vadd.f32 %v881_v33, %v859_v4  ;;  %v1231_v41 = vsel %vm816_vm6, %v1224_v43, %v1226_v38  ;;  %v1238_v42 = vadd.f32 %v1226_v38, %v1212_v15  ;;  %v922_v16 = vsel %vm921_vm9, %v2762_v34, %v916_v36 }
 0x1c3   : > { %v893_v44 = vadd.f32 %v887_v39, %v858_v26  ;;  %v1237_v46 = vadd.f32 %v1231_v41, %v1211_v60  ;;  %v990_v15 = vshrl.u32 %v989_v13, 7  ;;  %v1105_v60 = vmul.f32 %v2634_v23, %v2706_v37 }
 0x1c4   : > { %v929_v47 = vadd.f32 %v916_v36, %v894_v40  ;;  %v1264_v53 = vadd.f32 %v1252_v1, %v1238_v42 }
 0x1c5   : > { %v928_v54 = vadd.f32 %v922_v16, %v893_v44  ;;  %v1263_v55 = vadd.f32 %v1257_v49, %v1237_v46  ;;  %v2790_v28 = vpop.permute.xlu1 %847  ;;  %v2792_v56 = vpop.permute.xlu0 %672  ;;  %v991_v22 = vsub.s32 0, %v990_v15 }
 0x1c6   : > { %v943_v43 = vmul.f32 %v2714_v5, %v929_v47  ;;  %v2797_v12 = vadd.f32 %v1278_v30, %v1264_v53  ;;  %v995_v30 = vsub.s32 1, %v990_v15 }
 0x1c7   : > { %v942_v7 = vmul.f32 %v2714_v5, %v928_v54  ;;  %v2800_v58 = vadd.f32 %v1283_v21, %v1263_v55  ;;  %v2820_v36 = vrot.slane %v506_v27, %v991_v22 }
 0x1c8   : > { %v957_v34 = vadd.f32 %v2728_v10, %v943_v43  ;;  %v2818_v4 = vrot.slane %v506_v27, %v995_v30 }
 0x1c9   : > { %v956_v59 = vadd.f32 %v2728_v10, %v942_v7  ;;  %v2804_v35 = vpop.permute.xlu1 %1253  ;;  %v1124_v61 = vpop.permute.xlu0 %1123 }
 0x1ca   : > { %v1938_v62 = vmul.f32 -1.442695, %v957_v34 }
 0x1cb   : > { %v1937_v1 = vmul.f32 -1.442695, %v956_v59 }
 0x1cc   : > { %2139 = vpow2.f32 %v1938_v62 }
 0x1cd   : > { %2141 = vpow2.f32 %v1937_v1  ;;  %v2806_v20 = vpop.permute.xlu1 %882  ;;  %v708_v29 = vpop.permute.xlu0 %707 }
 0x1d1   : > { %v2808_v48 = vpop.permute.xlu1 %1279  ;;  %v1150_v3 = vpop.permute.xlu0 %1149 }
 0x1d5   : > { %v2810_v57 = vpop.permute.xlu1 %917  ;;  %v743_v8 = vpop.permute.xlu0 %742 }
 0x1d6   : > { %v2140_v11 = vpop.eup %2139 }
 0x1d7   : > { %v2142_v33 = vpop.eup %2141  ;;  %v973_v52 = vadd.f32 1.0, %v2140_v11 }
 0x1d8   : > { %v972_v14 = vadd.f32 1.0, %v2142_v33 }
 0x1d9   : > { %2143 = vrcp.f32 %v973_v52  ;;  %v1176_v31 = vpop.permute.xlu0 %1175  ;;  %v675_v63 = vpop.permute.xlu1 %674  ;;  %v1106_v52 = vmul.f32 %v2668_v51, %v2706_v37 }
 0x1da   : > { %2145 = vrcp.f32 %v972_v14 }
 0x1dd   : > { %v778_v9 = vpop.permute.xlu0 %777  ;;  %v1126_v17 = vpop.permute.xlu1 %1125 }
 0x1de   : > { %v1128_v32 = vsel %vm676_vm2, %v1124_v61, %v1126_v17  ;;  %v646_v61 = vmul.f32 %v2706_v37, %v2625_v18 }
 0x1df   : > { %v1135_v19 = vadd.f32 %v1128_v32, %v1105_v60  ;;  %v1136_v60 = vadd.f32 %v1126_v17, %v1106_v52 }
 0x1e1   : > { %v1202_v24 = vpop.permute.xlu0 %1201  ;;  %v710_v25 = vpop.permute.xlu1 %709 }
 0x1e2   : > { %v713_v11 = vsel %vm711_vm3, %v708_v29, %v710_v25 }
 0x1e3   : > { %v2144_v26 = vpop.eup %2143 }
 0x1e4   : > { %v2146_v38 = vpop.eup %2145  ;;  %v2822_v39 = vmul.f32 %v2144_v26, %v957_v34  ;;  %v647_v34 = vmul.f32 %v2706_v37, %v2660_v45 }
 0x1e5   : > { %v813_v23 = vpop.permute.xlu0 %812  ;;  %v1152_v40 = vpop.permute.xlu1 %1151  ;;  %v2824_v41 = vmul.f32 %v2146_v38, %v956_v59  ;;  %v678_v59 = vsel %vm676_vm2, %v2792_v56, %v675_v63  ;;  %vm1667_vm2 = vcmask 458064  }
 0x1e6   : > { %v1154_v42 = vsel %vm711_vm3, %v1150_v3, %v1152_v40  ;;  %v1000_v44 = vmul.f32 %v2818_v4, %v2822_v39  ;;  %v686_v3 = vadd.f32 %v675_v63, %v647_v34  ;;  %v685_v13 = vadd.f32 %v678_v59, %v646_v61 }
 0x1e7   : > { %v1161_v46 = vadd.f32 %v1154_v42, %v1135_v19  ;;  %v999_v49 = vmul.f32 %v2820_v36, %v2824_v41  ;;  %vm1672_vm3 = vcmask 572864  }
 0x1e8   : > { %v1003_v16 = vsel %vm921_vm9, %v1000_v44, 0.0  ;;  %v721_v14 = vadd.f32 %v710_v25, %v686_v3 }
 0x1e9   : > { %v1228_v47 = vpop.permute.xlu0 %1227  ;;  %v745_v53 = vpop.permute.xlu1 %744  ;;  %v1004_v54 = vadd.f32 %v1003_v16, %v999_v49 }
 0x1ea   : > { %v748_v45 = vsel %vm746_vm4, %v743_v8, %v745_v53  ;;  %v756_v32 = vadd.f32 %v745_v53, %v721_v14 }
 0x1eb   : > { %1005 = vadd.xlane.f32.xlu1 %v1004_v54 }
 0x1ed   : > { %v1304_v55 = vpop.permute.xlu0 %1303  ;;  %v1178_v21 = vpop.permute.xlu1 %1177 }
 0x1ee   : > { %v1180_v43 = vsel %vm746_vm4, %v1176_v31, %v1178_v21  ;;  %v1316_v33 = vadd.f32 %v1304_v55, %v2797_v12  ;;  %v720_v31 = vadd.f32 %v713_v11, %v685_v13  ;;  %v1162_v12 = vadd.f32 %v1152_v40, %v1136_v60 }
 0x1ef   : > { %v1187_v7 = vadd.f32 %v1180_v43, %v1161_v46  ;;  %vm1677_vm4 = vcmask 687664  }
 0x1f0   : > { %v755_v30 = vadd.f32 %v748_v45, %v720_v31  ;;  %v1320_v29 = vmul.f32 %v1316_v33, %v2714_v5  ;;  %v1188_v25 = vadd.f32 %v1178_v21, %v1162_v12 }
 0x1f1   : > { %v850_v62 = vpop.permute.xlu0 %849  ;;  %v780_v1 = vpop.permute.xlu1 %779 }
 0x1f2   : > { %v783_v18 = vsel %vm781_vm5, %v778_v9, %v780_v1  ;;  %v791_v27 = vadd.f32 %v780_v1, %v756_v32  ;;  %v2849_v17 = vadd.f32 %v1320_v29, %v2728_v10  ;;  %v853_v9 = vsel %vm851_vm7, %v2790_v28, %v850_v62 }
 0x1f3   : > { %v790_v22 = vadd.f32 %v783_v18, %v755_v30 }
 0x1f4   : > { %v1951_v53 = vmul.f32 -1.442695, %v2849_v17 }
 0x1f5   : > { %v1256_v15 = vpop.permute.xlu0 %1255  ;;  %v1204_v56 = vpop.permute.xlu1 %1203 }
 0x1f6   : > { %v1206_v63 = vsel %vm781_vm5, %v1202_v24, %v1204_v56  ;;  %v1214_v24 = vadd.f32 %v1204_v56, %v1188_v25  ;;  %2147 = vpow2.f32 %v1951_v53  ;;  %vm1700_vm5 = vcmask 97280  }
 0x1f7   : > { %v1213_v19 = vadd.f32 %v1206_v63, %v1187_v7 }
 0x1f9   : > { %v885_v51 = vpop.permute.xlu0 %884  ;;  %v815_v37 = vpop.permute.xlu1 %814 }
 0x1fa   : > { %v818_v8 = vsel %vm816_vm6, %v813_v23, %v815_v37  ;;  %v826_v26 = vadd.f32 %v815_v37, %v791_v27  ;;  %v1258_v23 = vsel %vm851_vm7, %v2804_v35, %v1256_v15  ;;  %v888_v21 = vsel %vm886_vm8, %v2806_v20, %v885_v51 }
 0x1fb   : > { %v825_v38 = vadd.f32 %v818_v8, %v790_v22  ;;  %vm1705_vm7 = vcmask 212064  }
 0x1fc   : > { %v861_v42 = vadd.f32 %v850_v62, %v826_v26 }
 0x1fd   : > { %v860_v44 = vadd.f32 %v853_v9, %v825_v38  ;;  %v1282_v46 = vpop.permute.xlu0 %1281  ;;  %v1230_v40 = vpop.permute.xlu1 %1229 }
 0x1fe   : > { %v1232_v49 = vsel %vm816_vm6, %v1228_v47, %v1230_v40  ;;  %v1240_v16 = vadd.f32 %v1230_v40, %v1214_v24  ;;  %v896_v7 = vadd.f32 %v885_v51, %v861_v42  ;;  %v1284_v35 = vsel %vm886_vm8, %v2808_v48, %v1282_v46 }
 0x1ff   : > { %v1239_v54 = vadd.f32 %v1232_v49, %v1213_v19  ;;  %v895_v59 = vadd.f32 %v888_v21, %v860_v44  ;;  %vm1682_vm6 = vcmask 802464   ;;  %vm1687_vm8 = vcmask 917264  }
 0x200   : > { %v1266_v43 = vadd.f32 %v1256_v15, %v1240_v16  ;;  %v2148_v27 = vpop.eup %2147 }
 0x201   : > { %v1265_v28 = vadd.f32 %v1258_v23, %v1239_v54  ;;  %v920_v34 = vpop.permute.xlu0 %919  ;;  %v1302_v61 = vpop.permute.xlu1 %1301 }
 0x202   : > { %v923_v62 = vsel %vm921_vm9, %v2810_v57, %v920_v34  ;;  %v931_v47 = vadd.f32 %v920_v34, %v896_v7  ;;  %v1309_v1 = vsel %vm921_vm9, %v1302_v61, %v1304_v55  ;;  %v1292_v13 = vadd.f32 %v1282_v46, %v1266_v43 }
 0x203   : > { %v930_v3 = vadd.f32 %v923_v62, %v895_v59  ;;  %v1315_v11 = vadd.f32 %v1309_v1, %v2800_v58  ;;  %v1291_v45 = vadd.f32 %v1284_v35, %v1265_v28 }
 0x204   : > { %v945_v20 = vmul.f32 %v2716_v6, %v931_v47 }
 0x205   : > { %v944_v33 = vmul.f32 %v2716_v6, %v930_v3  ;;  %v1319_v52 = vmul.f32 %v1315_v11, %v2714_v5  ;;  %v1308_v14 = vpop.permute.xlu0 %1307  ;;  %v1306_v57 = vpop.permute.xlu1 %1305 }
 0x206   : > { %v959_v31 = vadd.f32 %v2726_v50, %v945_v20  ;;  %v1318_v55 = vadd.f32 %v1308_v14, %v1292_v13  ;;  %v1310_v15 = vsel %vm921_vm9, %v1306_v57, %v1308_v14  ;;  %v1460_v20 = vld [vmem:[%s3059_s11] sm:$0xff]  ;;  %v2265_v13 = vmov 0.0|0.0  }
 0x207   : > { %v958_v58 = vadd.f32 %v2726_v50, %v944_v33  ;;  %v1323_v56 = vadd.f32 %v1319_v52, %v2728_v10  ;;  %v1317_v48 = vadd.f32 %v1310_v15, %v1291_v45  ;;  %v1340_v10 = vadd.f32 1.0, %v2148_v27  ;;  %2006 = vmatprep.subr.bf16.mxu0 %v2265_v13  ;;  %v1371_v33 = vld [vmem:[%s3057_s9] sm:$0x3] }
 0x208   : > { %v1940_v60 = vmul.f32 -1.442695, %v959_v31  ;;  %v1322_v32 = vmul.f32 %v1318_v55, %v2716_v6 }
 0x209   : > { %v1939_v18 = vmul.f32 -1.442695, %v958_v58  ;;  %v1950_v63 = vmul.f32 -1.442695, %v1323_v56  ;;  %v1321_v5 = vmul.f32 %v1317_v48, %v2716_v6 }
 0x20a   : > { %2149 = vpow2.f32 %v1940_v60  ;;  %v1326_v30 = vadd.f32 %v1322_v32, %v2726_v50 }
 0x20b   : > { %2151 = vpow2.f32 %v1939_v18  ;;  %v1325_v29 = vadd.f32 %v1321_v5, %v2726_v50 }
 0x20c   : > { %2153 = vpow2.f32 %v1950_v63  ;;  %v1953_v19 = vmul.f32 -1.442695, %v1326_v30 }
 0x20d   : > { %v1952_v12 = vmul.f32 -1.442695, %v1325_v29 }
 0x20e   : > { %2155 = vpow2.f32 %v1953_v19 }
 0x20f   : > { %2157 = vpow2.f32 %v1952_v12  ;;  %v1459_v12 = vld [vmem:[%s3058_s10 + $0x8] sm:$0xff] }
 0x210   : > { %2159 = vrcp.f32 %v1340_v10 }
 0x214   : > { %v2150_v22 = vpop.eup %2149 }
 0x215   : > { %v2152_v51 = vpop.eup %2151  ;;  %v975_v37 = vadd.f32 1.0, %v2150_v22 }
 0x216   : > { %v2154_v25 = vpop.eup %2153  ;;  %v974_v8 = vadd.f32 1.0, %v2152_v51 }
 0x217   : > { %2161 = vrcp.f32 %v975_v37  ;;  %v1339_v6 = vadd.f32 1.0, %v2154_v25 }
 0x218   : > { %v2156_v26 = vpop.eup %2155  ;;  %2163 = vrcp.f32 %v974_v8 }
 0x219   : > { %v2158_v38 = vpop.eup %2157  ;;  %2165 = vrcp.f32 %v1339_v6  ;;  %v1342_v50 = vadd.f32 1.0, %v2156_v26 }
 0x21a   : > { %v1341_v9 = vadd.f32 1.0, %v2158_v38  ;;  %v2160_v24 = vpop.eup %2159 }
 0x21b   : > { %2167 = vrcp.f32 %v1342_v50  ;;  %v2879_v40 = vmul.f32 %v2160_v24, %v2849_v17 }
 0x21c   : > { %2169 = vrcp.f32 %v1341_v9 }
 0x21d   : > { %v1356_v17 = vmul.f32 %v2879_v40, %v2818_v4 }
 0x21f   : > { %v1359_v3 = vsel %vm921_vm9, %v1356_v17, 0.0 }
 0x221   : > { %v2162_v42 = vpop.eup %2161 }
 0x222   : > { %v2164_v44 = vpop.eup %2163  ;;  %v2876_v46 = vmul.f32 %v2162_v42, %v959_v31 }
 0x223   : > { %v2166_v49 = vpop.eup %2165  ;;  %v2881_v16 = vmul.f32 %v2164_v44, %v958_v58  ;;  %v1370_v58 = vld [vmem:[%s3056_s8] sm:$0x3] }
 0x224   : > { %v1002_v53 = vmul.f32 %v2818_v4, %v2876_v46  ;;  %v2885_v54 = vmul.f32 %v2166_v49, %v1323_v56  ;;  %v1458_v56 = vld [vmem:[%s3058_s10] sm:$0xff] }
 0x225   : > { %v2168_v23 = vpop.eup %2167  ;;  %v1001_v21 = vmul.f32 %v2820_v36, %v2881_v16  ;;  %2003 = vmatprep.mubr.msk.f32.mxu1 %vm1472_vm13, %v1458_v56  ;;  %v1571_v44 = vld [vmem:[%s3061_s13] sm:$0xff] }
 0x226   : > { %v2170_v43 = vpop.eup %2169  ;;  %v2889_v7 = vmul.f32 %v2168_v23, %v1326_v30  ;;  %v1007_v28 = vsel %vm921_vm9, %v1002_v53, 0.0  ;;  %v1355_v61 = vmul.f32 %v2885_v54, %v2820_v36  ;;  %v1572_v49 = vld [vmem:[%s3062_s14] sm:$0xff] }
 0x227   : > { %v1008_v34 = vadd.f32 %v1007_v28, %v1001_v21  ;;  %v2894_v59 = vmul.f32 %v2170_v43, %v1325_v29 }
 0x228   : > { %v1358_v62 = vmul.f32 %v2889_v7, %v2818_v4  ;;  %v1360_v35 = vadd.f32 %v1359_v3, %v1355_v61  ;;  %v1461_v4 = vld [vmem:[%s3059_s11 + $0x8] sm:$0xff] }
 0x229   : > { %1009 = vadd.xlane.f32.xlu0 %v1008_v34  ;;  %v1357_v47 = vmul.f32 %v2894_v59, %v2820_v36  ;;  %v2267_v36 = vmov 0.0  }
 0x22a   : > { %v1363_v1 = vsel %vm921_vm9, %v1358_v62, 0.0  ;;  %1998 = vmatprep.mubr.msk.f32.mxu0 %vm2266_vm10, %v2267_v36  ;;  %vm1710_vm9 = vcmask 326864   ;;  %vm1693_vm10 = vcmask 1032064  }
 0x22b   : > { %v1364_v11 = vadd.f32 %v1363_v1, %v1357_v47 }
 0x22d   : > { %1365 = vadd.xlane.f32.xlu1 %v1364_v11  ;;  %1361 = vadd.xlane.f32.xlu0 %v1360_v35 }
 0x23e   : > { %1464 = vperm.xlu1 %2096, %v1460_v20  }
 0x242   : > { %1469 = vperm.xlu1 %2096, %v1461_v4   ;;  %v1963_v4 = vld [vmem:[%s2434_s18 + $0x8] sm:$0xff] }
 0x243   : > { %1374 = vperm.xlu0 %2095, %v1371_v33  }
 0x278   : > { %v1006_v52 = vpop.xlane.xlu1 %1005 }
 0x2b6   : > { %v1010_v14 = vpop.xlane.xlu0 %1009 }
 0x2ba   : > { %v1366_v45 = vpop.xlane.xlu1 %1365  ;;  %v1362_v57 = vpop.xlane.xlu0 %1361 }
 0x2bb   : > { %v1369_v31 = vsel %vm1367_vm11, %v1010_v14, %v1366_v45  ;;  %v1368_v55 = vsel %vm1367_vm11, %v1006_v52, %v1362_v57  ;;  %v1782_v45 = vunpack.c.l.bf16 %v1963_v4  ;;  %vm1698_vm11 = vcmask 1048560  }
 0x2bc   : > { %v2007_v15 = vpack.c.bf16 %v1369_v31, %v1368_v55 }
 0x2be   : > { %2008 = vmatpush3.bf16.msra.mxu0 %v2007_v15  ;;  %v1465_v27 = vpop.permute.xlu1 %1464 }
 0x2c1   : > { %1999 = vmatmul.mubr.msk.f32.vlgmr.msra.gmra.mrb[4].mxu0 %vm1377_vm12, %v1370_v58 }
 0x2c2   : > { %1624 = vmatprep.mubr.bf16.mxu0 %v2248_v0  ;;  %v1375_v48 = vpop.permute.xlu0 %1374  ;;  %v1470_v10 = vpop.permute.xlu1 %1469 }
 0x394   : > { %v1447_v60 = vpop.f32.mrb[4].mxu0 }
 0x395   : > { %v1448_v32 = vadd.f32 %v1447_v60, %v1375_v48  ;;  %v2000_v18 = vpop.f32.mrb[5].mxu0 }
 0x397   : > { %v1955_v63 = vmul.f32 -1.442695, %v1448_v32 }
 0x399   : > { %2171 = vpow2.f32 %v1955_v63 }
 0x3a3   : > { %v2172_v5 = vpop.eup %2171 }
 0x3a4   : > { %v1454_v30 = vadd.f32 1.0, %v2172_v5  ;;  %v1783_v5 = vunpack.c.h.bf16 %v1963_v4 }
 0x3a6   : > { %2173 = vrcp.f32 %v1454_v30 }
 0x3b0   : > { %v2174_v29 = vpop.eup %2173 }
 0x3b1   : > { %v1457_v19 = vmul.f32 %v2174_v29, %v1448_v32 }
 0x3b3   : > { %2001 = vmatprep.subr.msk.mxu1 %vm1479_vm14, %v1457_v19 }
 0x3b4   : > { %2002 = vmatpush3.msk.msra.mxu1 %vm1479_vm14, %v1457_v19 }
 0x3b5   : > { %2004 = vmatmul.mubr.msk.f32.vlgmr.msra.gmra.mrb[4].mxu1 %vm1472_vm13, %v1459_v12  ;;  %vm1720_vm13 = vcmask 556464  }
 0x3b6   : > { %1768 = vmatprep.mubr.bf16.mxu1 %v2248_v0 }
 0x488   : > { %v2005_v22 = vpop.f32.mrb[4].mxu1 }
 0x489   : > { %v1555_v51 = vadd.f32 %v2005_v22, %v1470_v10  ;;  %v1549_v37 = vpop.f32.mrb[5].mxu1 }
 0x48a   : > { %v1550_v25 = vadd.f32 %v1549_v37, %v1465_v27 }
 0x48b   : > { %v1960_v8 = vmul.f32 -1.442695, %v1555_v51 }
 0x48c   : > { %v1959_v6 = vmul.f32 -1.442695, %v1550_v25 }
 0x48d   : > { %2175 = vpow2.f32 %v1960_v8 }
 0x48e   : > { %2177 = vpow2.f32 %v1959_v6 }
 0x497   : > { %v2176_v26 = vpop.eup %2175 }
 0x498   : > { %v2178_v38 = vpop.eup %2177  ;;  %v1565_v50 = vadd.f32 1.0, %v2176_v26 }
 0x499   : > { %v1564_v9 = vadd.f32 1.0, %v2178_v38 }
 0x49a   : > { %2179 = vrcp.f32 %v1565_v50 }
 0x49b   : > { %2181 = vrcp.f32 %v1564_v9 }
 0x4a4   : > { %v2180_v24 = vpop.eup %2179 }
 0x4a5   : > { %v2182_v42 = vpop.eup %2181  ;;  %1580 = vperm.xlu1 %2096, %v2180_v24  }
 0x4a6   : > { %1575 = vperm.xlu0 %2095, %v2182_v42  }
 0x4a9   : > { %2098 = vset.pattern.permute.xlu1 %v2249_v2 }
 0x4aa   : > { %1727 = vperm.xlu1 %2098, %v2180_v24   ;;  %2097 = vset.pattern.permute.xlu0 %v2249_v2 }
 0x4ab   : > { %1723 = vperm.xlu0 %2097, %v2182_v42  }
 0x4ae   : > { %2099 = vset.pattern.permute.xlu1 %v2248_v0 }
 0x4af   : > { %2100 = vset.pattern.permute.xlu0 %v2248_v0  ;;  %1635 = vperm.xlu1 %2099, %v1571_v44  }
 0x4b0   : > { %1642 = vperm.xlu0 %2100, %v1572_v49  }
 0x4b4   : > { %2101 = vset.pattern.permute.xlu0 %v2249_v2 }
 0x524   : > { %v1581_v53 = vpop.permute.xlu1 %1580 }
 0x525   : > { %v1585_v23 = vmul.f32 %v1581_v53, %v2881_v16  ;;  %v1586_v21 = vmul.f32 %v1581_v53, %v2876_v46  ;;  %v1576_v43 = vpop.permute.xlu0 %1575 }
 0x526   : > { %v1583_v0 = vmul.f32 %v1576_v43, %v2824_v41  ;;  %v1584_v28 = vmul.f32 %v1576_v43, %v2822_v39  ;;  %v1570_v39 = vld [vmem:[%s3060_s12] sm:$0xf] }
 0x528   : > { %v1587_v17 = vpack.c.bf16 %v1585_v23, %v1583_v0  ;;  %v1588_v34 = vpack.c.bf16 %v1586_v21, %v1584_v28 }
 0x529   : > { %v1728_v61 = vpop.permute.xlu1 %1727 }
 0x52a   : > { %v1732_v62 = vmul.f32 %v1728_v61, %v2894_v59  ;;  %v1733_v47 = vmul.f32 %v1728_v61, %v2889_v7  ;;  %1592 = vmatprep.subr.bf16.mxu0 %v1588_v34  ;;  %v1724_v2 = vpop.permute.xlu0 %1723 }
 0x52b   : > { %v1730_v16 = vmul.f32 %v1724_v2, %v2885_v54  ;;  %v1731_v46 = vmul.f32 %v1724_v2, %v2879_v40  ;;  %1593 = vmatpush1.bf16.msra.mxu0 %v1587_v17  ;;  %v2183_v40 = vld [vmem:[%s2434_s18] sm:$0xff]  ;;  %s2269_s18 = smov 124  }
 0x52c   : > { %v1647_v3 = vunpack.c.l.bf16 %v2183_v40  ;;  %v1648_v60 = vunpack.c.h.bf16 %v2183_v40 }
 0x52d   : > { %v1734_v41 = vpack.c.bf16 %v1732_v62, %v1730_v16  ;;  %v1735_v1 = vpack.c.bf16 %v1733_v47, %v1731_v46 }
 0x52e   : > { %1961 = vmatmul.mubr.msk.bf16.vlgmr.msra.gmra.mrb[8].mxu0 %vm1377_vm12, %v1570_v39  ;;  %v1636_v7 = vpop.permute.xlu1 %1635 }
 0x52f   : > { %1736 = vmatprep.subr.bf16.mxu1 %v1735_v1  ;;  %v1643_v59 = vpop.permute.xlu0 %1642 }
 0x530   : > { %1737 = vmatpush1.bf16.msra.mxu1 %v1734_v41 }
 0x533   : > { %1962 = vmatmul.mubr.msk.bf16.vlgmr.msra.gmra.mrb[8].mxu1 %vm1377_vm12, %v1570_v39  ;;  %vm1715_vm12 = vcmask 441664  }
 0x601   : > { %v1626_v54 = vpop.f32.mrb[8].mxu0 }
 0x602   : > { %v1638_v11 = vmul.f32 %v1636_v7, %v1626_v54  ;;  %v1628_v35 = vpop.f32.mrb[9].mxu0 }
 0x603   : > { %v1630_v20 = vpop.f32.mrb[10].mxu0  ;;  %v1639_v56 = vmul.f32 %v1636_v7, %v1628_v35 }
 0x604   : > { %v1645_v13 = vadd.f32 %v1643_v59, %v1638_v11  ;;  %v1631_v36 = vpop.f32.mrb[11].mxu0 }
 0x605   : > { %v1646_v48 = vadd.f32 %v1643_v59, %v1639_v56 }
 0x606   : > { %v1649_v33 = vadd.f32 %v1647_v3, %v1645_v13  ;;  %v1770_v52 = vpop.f32.mrb[8].mxu1 }
 0x607   : > { %v1777_v14 = vmul.f32 %v1770_v52, %v1636_v7  ;;  %v1772_v57 = vpop.f32.mrb[9].mxu1  ;;  %v1650_v18 = vadd.f32 %v1648_v60, %v1646_v48 }
 0x608   : > { %1654 = vrot.lane.b32.xlu1 %v1649_v33, %s2260_s26  ;;  %1664 = vrot.lane.b32.xlu0 %v1649_v33, %s2268_s29  ;;  %v1774_v31 = vpop.f32.mrb[10].mxu1  ;;  %1652 = vst.msk [vmem:[%s2957_s30] sm:$0xff] %vm1651_vm15, %v1649_v33  ;;  %v1778_v32 = vmul.f32 %v1772_v57, %v1636_v7 }
 0x609   : > { %v1779_v55 = vadd.f32 %v1777_v14, %v1643_v59  ;;  %v1775_v15 = vpop.f32.mrb[11].mxu1 }
 0x60a   : > { %v1780_v63 = vadd.f32 %v1778_v32, %v1643_v59 }
 0x60b   : > { %v1784_v58 = vadd.f32 %v1782_v45, %v1779_v55 }
 0x60c   : > { %1659 = vrot.lane.b32.xlu1 %v1649_v33, %s2269_s18  ;;  %v1785_v30 = vadd.f32 %v1783_v5, %v1780_v63 }
 0x60d   : > { %1789 = vrot.lane.b32.xlu0 %v1784_v58, %s2260_s26  ;;  %1964 = vst.msk [vmem:[%s2957_s30 + $0x10] sm:$0xff] %vm1651_vm15, %v1784_v58  ;;  %s2272_s26 = smov 116  }
 0x610   : > { %1669 = vrot.lane.b32.xlu1 %v1649_v33, %s2270_s23 }
 0x611   : > { %1797 = vrot.lane.b32.xlu0 %v1784_v58, %s2268_s29  ;;  %s2275_s29 = smov 106  }
 0x614   : > { %1793 = vrot.lane.b32.xlu1 %v1784_v58, %s2269_s18  ;;  %s2276_s18 = smov 104  }
 0x615   : > { %1674 = vrot.lane.b32.xlu0 %v1649_v33, %s2271_s25 }
 0x618   : > { %1801 = vrot.lane.b32.xlu1 %v1784_v58, %s2270_s23  ;;  %s1858_s23 = sshll.u32 %s2957_s30, 4  ;;  %s3002_s23 = int_to_ptr.vmem [resolvable:$true] %s1858_s23 }
 0x619   : > { %1805 = vrot.lane.b32.xlu0 %v1784_v58, %s2271_s25 }
 0x61c   : > { %1695 = vrot.lane.b32.xlu1 %v1650_v18, %s2264_s24 }
 0x61d   : > { %1679 = vrot.lane.b32.xlu0 %v1649_v33, %s2272_s26 }
 0x620   : > { %1822 = vrot.lane.b32.xlu1 %v1785_v30, %s2264_s24  ;;  %s2277_s24 = smov 102  }
 0x621   : > { %1809 = vrot.lane.b32.xlu0 %v1784_v58, %s2272_s26 }
 0x624   : > { %1702 = vrot.lane.b32.xlu1 %v1650_v18, %s2273_s16 }
 0x625   : > { %1684 = vrot.lane.b32.xlu0 %v1649_v33, %s2274_s27 }
 0x628   : > { %1827 = vrot.lane.b32.xlu1 %v1785_v30, %s2273_s16 }
 0x629   : > { %1813 = vrot.lane.b32.xlu0 %v1784_v58, %s2274_s27  ;;  %s3007_s27 = scalar_lea.sflag [#allocation3], %s488_s20 }
 0x62c   : > { %1707 = vrot.lane.b32.xlu1 %v1650_v18, %s2275_s29 }
 0x62d   : > { %1690 = vrot.lane.b32.xlu0 %v1650_v18, %s2262_s17 }
 0x630   : > { %1831 = vrot.lane.b32.xlu1 %v1785_v30, %s2275_s29  ;;  %s2184_s29 = scalar_lea.vmem %s3002_s23, 512 }
 0x631   : > { %1818 = vrot.lane.b32.xlu0 %v1785_v30, %s2262_s17  ;;  %s1987_s17 = sshll.u32 %s2382_s22, 9  ;;  %p2185_p11 = scmp.ne.s32.totalorder %s3002_s23, %s2184_s29 }
 0x632   : > { %s3000_s16 = scalar_lea.hbm %s3063_s15, %s1987_s17  ;;  %s2278_s22 = smov [#allocation2]  }
 0x633   : > { %p2186_p12 = pnand %p2185_p11, %p2399_p5 }
 0x634   : > { %1712 = vrot.lane.b32.xlu1 %v1650_v18, %s2276_s18 }
 0x635   : > { %1717 = vrot.lane.b32.xlu0 %v1650_v18, %s2277_s24  ;;  %p2187_p13 = pneg %p2186_p12 }
 0x638   : > { %1835 = vrot.lane.b32.xlu1 %v1785_v30, %s2276_s18  ;;  %s2188_s18 = sshll.u32 %s2278_s22, 4  ;;  %s2189_s18 = int_to_ptr.vmem [resolvable:$false] %s2188_s18 }
 0x639   : > { %p2191_p0 = scmp.lt.s32.totalorder %s3002_s23, %s2189_s18 }
 0x63c   : > { %1839 = vrot.lane.b32.xlu1 %v1785_v30, %s2277_s24  ;;  %s2190_s24 = scalar_lea.vmem %s2189_s18, 1024 }
 0x63d   : > { %p2192_p1 = scmp.lt.s32.totalorder %s2190_s24, %s2184_s29 }
 0x63f   : > { %p2193_p2 = por %p2192_p1, %p2191_p0 }
 0x641   : > { %p2194_p3 = pnand %p2193_p2, %p2187_p13 }
 0x67a   : > { %v1655_v29 = vpop.permute.xlu1 %1654  ;;  %v1665_v19 = vpop.permute.xlu0 %1664 }
 0x67b   : > { %1658 = vst.msk [vmem:[%s2957_s30] sm:$0xff] %vm1657_vm0, %v1655_v29 }
 0x67e   : > { %v1660_v12 = vpop.permute.xlu1 %1659 }
 0x67f   : > { %1663 = vst.msk [vmem:[%s2957_s30] sm:$0xff] %vm1662_vm1, %v1660_v12  ;;  %v1790_v27 = vpop.permute.xlu0 %1789 }
 0x680   : > { %1965 = vst.msk [vmem:[%s2957_s30 + $0x10] sm:$0xff] %vm1657_vm0, %v1790_v27 }
 0x681   : > { %1668 = vst.msk [vmem:[%s2957_s30] sm:$0xff] %vm1667_vm2, %v1665_v19 }
 0x682   : > { %v1670_v10 = vpop.permute.xlu1 %1669 }
 0x683   : > { %1673 = vst.msk [vmem:[%s2957_s30] sm:$0xff] %vm1672_vm3, %v1670_v10  ;;  %v1798_v22 = vpop.permute.xlu0 %1797 }
 0x686   : > { %v1794_v51 = vpop.permute.xlu1 %1793 }
 0x687   : > { %1966 = vst.msk [vmem:[%s2957_s30 + $0x10] sm:$0xff] %vm1662_vm1, %v1794_v51  ;;  %v1675_v37 = vpop.permute.xlu0 %1674 }
 0x688   : > { %1967 = vst.msk [vmem:[%s2957_s30 + $0x10] sm:$0xff] %vm1667_vm2, %v1798_v22 }
 0x689   : > { %1678 = vst.msk [vmem:[%s2957_s30] sm:$0xff] %vm1677_vm4, %v1675_v37 }
 0x68a   : > { %v1802_v25 = vpop.permute.xlu1 %1801 }
 0x68b   : > { %1968 = vst.msk [vmem:[%s2957_s30 + $0x10] sm:$0xff] %vm1672_vm3, %v1802_v25  ;;  %v1806_v8 = vpop.permute.xlu0 %1805 }
 0x68c   : > { %1969 = vst.msk [vmem:[%s2957_s30 + $0x10] sm:$0xff] %vm1677_vm4, %v1806_v8 }
 0x68e   : > { %v1696_v6 = vpop.permute.xlu1 %1695 }
 0x68f   : > { %1701 = vst.msk [vmem:[%s2957_s30 + $0x8] sm:$0xff] %vm1700_vm5, %v1696_v6  ;;  %v1680_v26 = vpop.permute.xlu0 %1679 }
 0x690   : > { %1683 = vst.msk [vmem:[%s2957_s30] sm:$0xff] %vm1682_vm6, %v1680_v26 }
 0x692   : > { %v1823_v38 = vpop.permute.xlu1 %1822 }
 0x693   : > { %1974 = vst.msk [vmem:[%s2957_s30 + $0x18] sm:$0xff] %vm1700_vm5, %v1823_v38  ;;  %v1810_v50 = vpop.permute.xlu0 %1809 }
 0x694   : > { %1970 = vst.msk [vmem:[%s2957_s30 + $0x10] sm:$0xff] %vm1682_vm6, %v1810_v50 }
 0x696   : > { %v1703_v9 = vpop.permute.xlu1 %1702 }
 0x697   : > { %1706 = vst.msk [vmem:[%s2957_s30 + $0x8] sm:$0xff] %vm1705_vm7, %v1703_v9  ;;  %v1685_v24 = vpop.permute.xlu0 %1684 }
 0x698   : > { %1688 = vst.msk [vmem:[%s2957_s30] sm:$0xff] %vm1687_vm8, %v1685_v24 }
 0x69a   : > { %v1828_v42 = vpop.permute.xlu1 %1827 }
 0x69b   : > { %1975 = vst.msk [vmem:[%s2957_s30 + $0x18] sm:$0xff] %vm1705_vm7, %v1828_v42  ;;  %v1814_v44 = vpop.permute.xlu0 %1813 }
 0x69c   : > { %1971 = vst.msk [vmem:[%s2957_s30 + $0x10] sm:$0xff] %vm1687_vm8, %v1814_v44 }
 0x69e   : > { %v1708_v49 = vpop.permute.xlu1 %1707 }
 0x69f   : > { %1711 = vst.msk [vmem:[%s2957_s30 + $0x8] sm:$0xff] %vm1710_vm9, %v1708_v49  ;;  %v1691_v53 = vpop.permute.xlu0 %1690 }
 0x6a0   : > { %1694 = vst.msk [vmem:[%s2957_s30] sm:$0xff] %vm1693_vm10, %v1691_v53 }
 0x6a1   : > { %1699 = vst.msk [vmem:[%s2957_s30] sm:$0xff] %vm1698_vm11, %v1696_v6 }
 0x6a2   : > { %v1832_v23 = vpop.permute.xlu1 %1831 }
 0x6a3   : > { %1976 = vst.msk [vmem:[%s2957_s30 + $0x18] sm:$0xff] %vm1710_vm9, %v1832_v23  ;;  %v1819_v21 = vpop.permute.xlu0 %1818 }
 0x6a4   : > { %1972 = vst.msk [vmem:[%s2957_s30 + $0x10] sm:$0xff] %vm1693_vm10, %v1819_v21 }
 0x6a5   : > { %1973 = vst.msk [vmem:[%s2957_s30 + $0x10] sm:$0xff] %vm1698_vm11, %v1823_v38 }
 0x6a6   : > { %v1713_v43 = vpop.permute.xlu1 %1712 }
 0x6a7   : > { %1716 = vst.msk [vmem:[%s2957_s30 + $0x8] sm:$0xff] %vm1715_vm12, %v1713_v43  ;;  %v1718_v0 = vpop.permute.xlu0 %1717 }
 0x6a8   : > { %1721 = vst.msk [vmem:[%s2957_s30 + $0x8] sm:$0xff] %vm1720_vm13, %v1718_v0 }
 0x6aa   : > { %v1836_v28 = vpop.permute.xlu1 %1835 }
 0x6ab   : > { %1977 = vst.msk [vmem:[%s2957_s30 + $0x18] sm:$0xff] %vm1715_vm12, %v1836_v28 }
 0x6ae   : > { %v1840_v17 = vpop.permute.xlu1 %1839 }
 0x6af   : > { %1978 = vst.msk [vmem:[%s2957_s30 + $0x18] sm:$0xff] %vm1720_vm13, %v1840_v17 }
 0x6b0   : > { %2197 = shalt.err (!%p2194_p3)
}
 0x6b1   : > { %s2198_s20 = scalar_lea.hbm %s3000_s16, 512  ;;  %s2202_s25 = scalar_lea.hbm %s3063_s15, 1024 }
 0x6b2   : > { %p2199_p4 = scmp.ne.s32.totalorder %s3000_s16, %s2198_s20  ;;  %p2203_p9 = scmp.lt.u32.totalorder %s3000_s16, %s3063_s15 }
 0x6b3   : > { %p2204_p10 = scmp.lt.u32.totalorder %s2202_s25, %s2198_s20  ;;  %p2206_p12 = scmp.lt.u32.totalorder %s2198_s20, %s3000_s16 }
 0x6b4   : > { %p2200_p7 = pnand %p2199_p4, %p2399_p5 }
 0x6b5   : > { %p2205_p11 = por %p2204_p10, %p2203_p9 }
 0x6b6   : > { %p2201_p8 = pneg %p2200_p7 }
 0x6b7   : > { %p2207_p13 = por %p2206_p12, %p2205_p11 }
 0x6b9   : > { %p2208_p0 = pnand %p2207_p13, %p2201_p8 }
 0x6bb   : > { %2211 = shalt.err (!%p2208_p0)
}
 0x6bc   : > { %s2279_s29 = smov 256   ;;  %s2280_s18 = smov 16  }
 0x6bd   : > { %2009 = dma.vmem_to_hbm [thread:$0]  (%p2399_p5), %s3002_s23, 512, %s3000_s16, %s3007_s27, %s2279_s29, %s2279_s29, %s2280_s18  }
 0x6be PF: > { %s3076_s24 = sld [smem:[#allocation5_spill]]  ;;  %p2015_p1 = scmp.ge.s32.totalorder %s2246_s21, 2 }
 0x6c0   : > { %p2012_p2 = pnand %p2015_p1, %p2403_p6 }
 0x6c4   : > { %s1873_s17 = sand.u32 1, %s3076_s24  }
 0x6c5   : > { %s1874_s20 = scalar_lea.sflag [#allocation3], %s1873_s17 }
 0x6c6   : > { %2229 = dma.done.wait (!%p2012_p2), %s1874_s20, 512  }
 0x6c7   : > { %2231 = vsyncadd (!%p2012_p2), %s1874_s20, 4294966784  ;;  %s3078_s21 = sld [smem:[#allocation7_spill]]  ;;  %s3079_s25 = sld [smem:[#allocation6_spill]] }
 0x6c8   : > { %s3080_s20 = sld [smem:[#allocation8_spill]]  ;;  %s3081_s18 = smov %s2238_s19 }
 0x6cd   : > { %p25_p3 = scmp.ge.s32.totalorder %s3078_s21, 4   ;;  %s3082_s19 = smov %s3079_s25 }
 0x6cf   :  { %27 = sbr.rel (!%p25_p3) target bundleno = 3 (0x3), region = 117 }
 0x6d6   :  { %1879 = vsyncpa [#allocation3], 1 }
 0x6d7   :  { %1881 = vsyncpa [#allocation3 + $0x1], 1 }

</bundles_post_ra>
